<compile_context>
chip_gen: v5e
topology: v5e:2x2
jax: 0.10.0
libtpu: 0.0.40
codegen_flags: <defaults>
</compile_context>

<pallas_src>
import functools

import jax
import jax.numpy as jnp
from jax.experimental import pallas as pl
from jax.experimental.pallas import tpu as pltpu

_HIGHEST = jax.lax.Precision.HIGHEST


# --------------------------------------------------------------------------- kernels


def _matmul_bias_kernel(x_ref, w_ref, b_ref, o_ref, *, relu):
    """o = [relu](x @ w + b); conv+BN(+ReLU) fused as an MXU matmul with f32 accumulation."""
    acc = jnp.dot(x_ref[...], w_ref[...],
                  preferred_element_type=jnp.float32, precision=_HIGHEST)
    acc = acc + b_ref[...]
    if relu:
        acc = jnp.maximum(acc, 0.0)
    o_ref[...] = acc.astype(o_ref.dtype)


def _tail_kernel(p3_ref, wdw2_ref, bdw2_ref, wc2_ref, bc2_ref,
                 p5_ref, wsdw_ref, bsdw_ref, wsc_ref, bsc_ref, o_ref,
                 *, cmid, cin):
    """Fused: dwconv2+BN -> conv2(1x1)+BN ; shortcut dw+BN -> 1x1+BN ; add ; ReLU."""
    # main branch: true depthwise 3x3 (per-tap VPU multiply-accumulate) + BN bias
    p3 = p3_ref[...]
    f = p3[:, 0:cmid] * wdw2_ref[0:1, :]
    for t in range(1, 9):
        f = f + p3[:, t * cmid:(t + 1) * cmid] * wdw2_ref[t:t + 1, :]
    f = f + bdw2_ref[...]
    # 1x1 conv + BN (MXU)
    f = jnp.dot(f, wc2_ref[...],
                preferred_element_type=jnp.float32, precision=_HIGHEST) + bc2_ref[...]

    # shortcut branch: depthwise 3x3 stride-2 + BN, then 1x1 conv + BN
    p5 = p5_ref[...]
    s = p5[:, 0:cin] * wsdw_ref[0:1, :]
    for t in range(1, 9):
        s = s + p5[:, t * cin:(t + 1) * cin] * wsdw_ref[t:t + 1, :]
    s = s + bsdw_ref[...]
    s = jnp.dot(s, wsc_ref[...],
                preferred_element_type=jnp.float32, precision=_HIGHEST) + bsc_ref[...]

    o_ref[...] = jnp.maximum(f + s, 0.0).astype(o_ref.dtype)


# ------------------------------------------------------------------- pallas wrappers


def _round_up(x, m):
    return (x + m - 1) // m * m


def _fused_matmul(x, w, b, *, relu, tile_r=256):
    """Row-tiled fused (x @ w + b) [+ReLU].  x: (R, K), w: (K, O), b: (1, O)."""
    R, K = x.shape
    O = w.shape[1]
    tile_r = min(tile_r, _round_up(R, 8))
    Rp = _round_up(R, tile_r)
    if Rp != R:
        x = jnp.pad(x, ((0, Rp - R), (0, 0)))
    out = pl.pallas_call(
        functools.partial(_matmul_bias_kernel, relu=relu),
        out_shape=jax.ShapeDtypeStruct((Rp, O), jnp.float32),
        grid_spec=pltpu.PrefetchScalarGridSpec(
            num_scalar_prefetch=0,
            grid=(Rp // tile_r,),
            in_specs=[
                pl.BlockSpec((tile_r, K), lambda i: (i, 0)),
                pl.BlockSpec((K, O), lambda i: (0, 0)),
                pl.BlockSpec((1, O), lambda i: (0, 0)),
            ],
            out_specs=pl.BlockSpec((tile_r, O), lambda i: (i, 0)),
        ),
        compiler_params=pltpu.CompilerParams(dimension_semantics=("parallel",)),
    )(x, w, b)
    return out[:R]


def _fused_tail(p3, p5, wdw2, bdw2, wc2, bc2, wsdw, bsdw, wsc, bsc, *, tile_r=256):
    """Row-tiled fused tail of GELayerS2.  p3: (R, 9*Cmid), p5: (R, 9*Cin) -> (R, Cout)."""
    R = p3.shape[0]
    cmid = wdw2.shape[1]
    cin = wsdw.shape[1]
    cout = wc2.shape[1]
    tile_r = min(tile_r, _round_up(R, 8))
    Rp = _round_up(R, tile_r)
    if Rp != R:
        p3 = jnp.pad(p3, ((0, Rp - R), (0, 0)))
        p5 = jnp.pad(p5, ((0, Rp - R), (0, 0)))
    out = pl.pallas_call(
        functools.partial(_tail_kernel, cmid=cmid, cin=cin),
        out_shape=jax.ShapeDtypeStruct((Rp, cout), jnp.float32),
        grid_spec=pltpu.PrefetchScalarGridSpec(
            num_scalar_prefetch=0,
            grid=(Rp // tile_r,),
            in_specs=[
                pl.BlockSpec((tile_r, p3.shape[1]), lambda i: (i, 0)),
                pl.BlockSpec(wdw2.shape, lambda i: (0, 0)),
                pl.BlockSpec(bdw2.shape, lambda i: (0, 0)),
                pl.BlockSpec(wc2.shape, lambda i: (0, 0)),
                pl.BlockSpec(bc2.shape, lambda i: (0, 0)),
                pl.BlockSpec((tile_r, p5.shape[1]), lambda i: (i, 0)),
                pl.BlockSpec(wsdw.shape, lambda i: (0, 0)),
                pl.BlockSpec(bsdw.shape, lambda i: (0, 0)),
                pl.BlockSpec(wsc.shape, lambda i: (0, 0)),
                pl.BlockSpec(bsc.shape, lambda i: (0, 0)),
            ],
            out_specs=pl.BlockSpec((tile_r, cout), lambda i: (i, 0)),
        ),
        compiler_params=pltpu.CompilerParams(dimension_semantics=("parallel",)),
    )(p3, wdw2, bdw2, wc2, bc2, p5, wsdw, bsdw, wsc, bsc)
    return out[:R]


# ------------------------------------------------------- wrapper-side layout plumbing


def _im2col_3x3(x_nhwc, stride):
    """(N, H, W, C) -> (N*Ho*Wo, 9*C) patches, tap-major / channel-minor ordering."""
    N, H, W, C = x_nhwc.shape
    xp = jnp.pad(x_nhwc, ((0, 0), (1, 1), (1, 1), (0, 0)))
    Ho = (H + 2 - 3) // stride + 1
    Wo = (W + 2 - 3) // stride + 1
    taps = []
    for dy in range(3):
        for dx in range(3):
            taps.append(xp[:, dy:dy + (Ho - 1) * stride + 1:stride,
                           dx:dx + (Wo - 1) * stride + 1:stride, :])
    patches = jnp.concatenate(taps, axis=-1)          # (N, Ho, Wo, 9*C)
    return patches.reshape(N * Ho * Wo, 9 * C), (Ho, Wo)


def _bn_fold(gamma, beta, mean, var, eps=1e-5):
    s = gamma * jax.lax.rsqrt(var + eps)
    return s, beta - mean * s


def _flat_conv_w(w_oihw, s):
    """(O, I, 3, 3) -> (9*I, O), tap-major; per-output-channel BN scale folded in."""
    w = jnp.transpose(w_oihw, (2, 3, 1, 0)) * s[None, None, None, :]   # (3, 3, I, O)
    return w.reshape(-1, w.shape[-1])


def _flat_expand_dw_w(w, cin, s):
    """Grouped expand conv weight (Cmid, 1, 3, 3), groups=cin -> dense (9*cin, Cmid)."""
    # TODO(synk): at production channel counts, implement the depthwise-expand conv with
    # per-channel VPU MACs instead of this (exact but zero-padded) dense-ified MXU weight.
    cmid = w.shape[0]
    r = cmid // cin
    w_taps = jnp.transpose(w[:, 0], (1, 2, 0))                           # (3, 3, Cmid)
    mask = ((jnp.arange(cmid)[None, :] // r) ==
            jnp.arange(cin)[:, None]).astype(w.dtype)                    # (cin, Cmid)
    dense = w_taps[:, :, None, :] * mask[None, None, :, :]               # (3,3,cin,Cmid)
    dense = dense * s[None, None, None, :]
    return dense.reshape(9 * cin, cmid)


def _dw_taps_w(w, s):
    """Depthwise weight (C, 1, 3, 3) -> (9, C) per-tap vectors with BN scale folded in."""
    C = w.shape[0]
    taps = jnp.transpose(w[:, 0].reshape(C, 9), (1, 0))                  # (9, C)
    return taps * s[None, :]


def gelayer_s2_forward(x_nchw, params):
    """GELayerS2 forward via Pallas.  x: (N, Cin, H, W) -> (N, Cout, H//2, W//2)."""
    N, Cin, H, W = x_nchw.shape
    x = jnp.transpose(x_nchw, (0, 2, 3, 1)).astype(jnp.float32)          # NHWC

    s1, b1 = _bn_fold(*params["bn1"])
    s2, b2 = _bn_fold(*params["bn_dw1"])
    s3, b3 = _bn_fold(*params["bn_dw2"])
    s4, b4 = _bn_fold(*params["bn_c2"])
    s5, b5 = _bn_fold(*params["bn_sc_dw"])
    s6, b6 = _bn_fold(*params["bn_sc_1x1"])

    w1 = _flat_conv_w(params["w1"], s1)                                  # (9*Cin, Cin)
    wdw1 = _flat_expand_dw_w(params["w_dw1"], Cin, s2)                   # (9*Cin, Cmid)
    wdw2 = _dw_taps_w(params["w_dw2"], s3)                               # (9, Cmid)
    wc2 = jnp.transpose(params["w_c2"][:, :, 0, 0], (1, 0)) * s4[None, :]     # (Cmid, Cout)
    wsdw = _dw_taps_w(params["w_sc_dw"], s5)                             # (9, Cin)
    wsc = jnp.transpose(params["w_sc_1x1"][:, :, 0, 0], (1, 0)) * s6[None, :]  # (Cin, Cout)

    Cmid = wdw1.shape[1]
    Cout = wc2.shape[1]

    # conv1: 3x3 s1 + BN + ReLU
    p1, _ = _im2col_3x3(x, stride=1)
    f1 = _fused_matmul(p1, w1, b1[None, :], relu=True).reshape(N, H, W, Cin)

    # dwconv1: depthwise-expand 3x3 s2 + BN
    p2, (Ho, Wo) = _im2col_3x3(f1, stride=2)
    f2 = _fused_matmul(p2, wdw1, b2[None, :], relu=False).reshape(N, Ho, Wo, Cmid)

    # fused tail: dwconv2+BN, conv2(1x1)+BN, shortcut (dw s2 + BN, 1x1 + BN), add, ReLU
    p3, _ = _im2col_3x3(f2, stride=1)                                    # (N*Ho*Wo, 9*Cmid)
    p5, _ = _im2col_3x3(x, stride=2)                                     # (N*Ho*Wo, 9*Cin)
    out = _fused_tail(p3, p5, wdw2, b3[None, :], wc2, b4[None, :],
                      wsdw, b5[None, :], wsc, b6[None, :])               # (N*Ho*Wo, Cout)
    out = out.reshape(N, Ho, Wo, Cout)
    return jnp.transpose(out, (0, 3, 1, 2))                              # back to NCHW


# ------------------------------------------------------------ pure-JAX reference check


def _conv_ref(x, w, stride, pad, groups):
    return jax.lax.conv_general_dilated(
        x, w, window_strides=(stride, stride),
        padding=((pad, pad), (pad, pad)),
        feature_group_count=groups,
        dimension_numbers=("NCHW", "OIHW", "NCHW"),
        precision=_HIGHEST)


def _bn_ref(x, bn, eps=1e-5):
    gamma, beta, mean, var = bn
    s = gamma * jax.lax.rsqrt(var + eps)
    return x * s[None, :, None, None] + (beta - mean * s)[None, :, None, None]


def gelayer_s2_reference(x, p):
    cin = x.shape[1]
    cmid = p["w_dw1"].shape[0]
    f = jnp.maximum(_bn_ref(_conv_ref(x, p["w1"], 1, 1, 1), p["bn1"]), 0.0)
    f = _bn_ref(_conv_ref(f, p["w_dw1"], 2, 1, cin), p["bn_dw1"])
    f = _bn_ref(_conv_ref(f, p["w_dw2"], 1, 1, cmid), p["bn_dw2"])
    f = _bn_ref(_conv_ref(f, p["w_c2"], 1, 0, 1), p["bn_c2"])
    sc = _bn_ref(_conv_ref(x, p["w_sc_dw"], 2, 1, cin), p["bn_sc_dw"])
    sc = _bn_ref(_conv_ref(sc, p["w_sc_1x1"], 1, 0, 1), p["bn_sc_1x1"])
    return jnp.maximum(f + sc, 0.0)


if __name__ == "__main__":
    key = jax.random.PRNGKey(0)
    N, Cin, H, W = 2, 4, 16, 16
    exp_ratio = 6
    Cout = 8
    Cmid = Cin * exp_ratio

    ks = jax.random.split(key, 13)

    def bn_params(k, c):
        k1, k2, k3, k4 = jax.random.split(k, 4)
        gamma = 1.0 + 0.1 * jax.random.normal(k1, (c,), jnp.float32)
        beta = 0.1 * jax.random.normal(k2, (c,), jnp.float32)
        mean = 0.1 * jax.random.normal(k3, (c,), jnp.float32)
        var = 0.5 + jax.random.uniform(k4, (c,), jnp.float32)
        return (gamma, beta, mean, var)

    params = {
        "w1": 0.3 * jax.random.normal(ks[0], (Cin, Cin, 3, 3), jnp.float32),
        "bn1": bn_params(ks[1], Cin),
        "w_dw1": 0.3 * jax.random.normal(ks[2], (Cmid, 1, 3, 3), jnp.float32),
        "bn_dw1": bn_params(ks[3], Cmid),
        "w_dw2": 0.3 * jax.random.normal(ks[4], (Cmid, 1, 3, 3), jnp.float32),
        "bn_dw2": bn_params(ks[5], Cmid),
        "w_c2": 0.3 * jax.random.normal(ks[6], (Cout, Cmid, 1, 1), jnp.float32),
        "bn_c2": bn_params(ks[7], Cout),
        "w_sc_dw": 0.3 * jax.random.normal(ks[8], (Cin, 1, 3, 3), jnp.float32),
        "bn_sc_dw": bn_params(ks[9], Cin),
        "w_sc_1x1": 0.3 * jax.random.normal(ks[10], (Cout, Cin, 1, 1), jnp.float32),
        "bn_sc_1x1": bn_params(ks[11], Cout),
    }

    x = jax.random.normal(ks[12], (N, Cin, H, W), dtype=jnp.float32)

    out = jax.block_until_ready(gelayer_s2_forward(x, params))
    ref = jax.block_until_ready(gelayer_s2_reference(x, params))

    assert out.shape == (N, Cout, H // 2, W // 2), out.shape
    max_err = float(jnp.max(jnp.abs(out - ref)))
    assert jnp.allclose(out, ref, atol=1e-3, rtol=1e-3), f"mismatch vs reference: {max_err}"

    print("KERNEL_OK")
</pallas_src>

<mosaic_0001>
module attributes {stable_mosaic.version = 11 : i64} {
  func.func @_matmul_bias_kernel(%arg0: i32, %arg1: memref<256x36xf32, #tpu.memory_space<vmem>>, %arg2: memref<36x4xf32, #tpu.memory_space<vmem>>, %arg3: memref<1x4xf32, #tpu.memory_space<vmem>>, %arg4: memref<256x4xf32, #tpu.memory_space<vmem>>) attributes {dimension_semantics = [#tpu.dimension_semantics<parallel>], iteration_bounds = array<i64: 2>, scalar_prefetch = 0 : i64, scratch_operands = 0 : i64, tpu.core_type = #tpu.core_type<tc>, window_params = [{transform_indices = @transform_0, window_bounds = array<i64: 256, 36>}, {pipeline_mode = #tpu.pipeline_mode<synchronous>, transform_indices = @transform_1, window_bounds = array<i64: 36, 4>}, {pipeline_mode = #tpu.pipeline_mode<synchronous>, transform_indices = @transform_2, window_bounds = array<i64: 1, 4>}, {transform_indices = @transform_3, window_bounds = array<i64: 256, 4>}]} {
    %c0 = arith.constant 0 : index
    %c0_0 = arith.constant 0 : index
    %0 = vector.load %arg1[%c0, %c0_0] : memref<256x36xf32, #tpu.memory_space<vmem>>, vector<256x36xf32>
    %c0_1 = arith.constant 0 : index
    %c0_2 = arith.constant 0 : index
    %1 = vector.load %arg2[%c0_1, %c0_2] : memref<36x4xf32, #tpu.memory_space<vmem>>, vector<36x4xf32>
    %cst = arith.constant dense<0.000000e+00> : vector<256x4xf32>
    %2 = tpu.matmul %0, %1, %cst {dimension_numbers = #tpu.dot_dimension_numbers<[1], [0], [0], [1], [0, 0, 1, 1], [], []>, precision = #tpu.contract_precision<fp32>} : vector<256x36xf32>, vector<36x4xf32>, vector<256x4xf32> -> vector<256x4xf32>
    %c0_3 = arith.constant 0 : index
    %c0_4 = arith.constant 0 : index
    %3 = vector.load %arg3[%c0_3, %c0_4] : memref<1x4xf32, #tpu.memory_space<vmem>>, vector<1x4xf32>
    %4 = vector.broadcast %3 : vector<1x4xf32> to vector<256x4xf32>
    %5 = arith.addf %2, %4 : vector<256x4xf32>
    %cst_5 = arith.constant 0.000000e+00 : f32
    %6 = vector.broadcast %cst_5 : f32 to vector<256x4xf32>
    %7 = arith.maximumf %5, %6 : vector<256x4xf32>
    %c0_6 = arith.constant 0 : index
    %c0_7 = arith.constant 0 : index
    %8 = vector.load %arg4[%c0_6, %c0_7] : memref<256x4xf32, #tpu.memory_space<vmem>>, vector<256x4xf32>
    tpu.vector_store %arg4[%c0_6, %c0_7], %7 {strides = array<i32>} : memref<256x4xf32, #tpu.memory_space<vmem>>, vector<256x4xf32>,
    return
  }
  func.func @transform_0(%arg0: i32) -> (i32, i32) {
    %c0_i32 = arith.constant 0 : i32
    %c0_i32_0 = arith.constant 0 : i32
    return %arg0, %c0_i32 : i32, i32
  }
  func.func @transform_1(%arg0: i32) -> (i32, i32) {
    %c0_i32 = arith.constant 0 : i32
    %c0_i32_0 = arith.constant 0 : i32
    %c0_i32_1 = arith.constant 0 : i32
    return %c0_i32, %c0_i32_0 : i32, i32
  }
  func.func @transform_2(%arg0: i32) -> (i32, i32) {
    %c0_i32 = arith.constant 0 : i32
    %c0_i32_0 = arith.constant 0 : i32
    %c0_i32_1 = arith.constant 0 : i32
    return %c0_i32, %c0_i32_0 : i32, i32
  }
  func.func @transform_3(%arg0: i32) -> (i32, i32) {
    %c0_i32 = arith.constant 0 : i32
    %c0_i32_0 = arith.constant 0 : i32
    return %arg0, %c0_i32 : i32, i32
  }
}

</mosaic_0001>

<bundles_post_ra>
// kernel: tpu_custom_call.1
= control target key start
LH: loop header
LB: loop body
LE: loop exit
PB: predicated region body
PF: predicated region fallthrough
CT: control target
= control target key end

     0   :  { %s1654_s12 = smov 0   ;;  %s2553_s0 = inlined_call_operand.vmem [shape: f32[512,36], index: 0, kind: input, shape index: {}]   ;;  %s2554_s1 = inlined_call_operand.vmem [shape: f32[36,4], index: 1, kind: input, shape index: {}]   ;;  %s2555_s2 = inlined_call_operand.vmem [shape: f32[1,4], index: 2, kind: input, shape index: {}]   ;;  %s2556_s3 = inlined_call_operand.vmem [shape: f32[512,4], index: 3, kind: output, shape index: {}]  }
   0x1 LB: > { %s1596_s13 = sadd.s32 4294967295, %s1632_s12   ;;  %p1600_p0 = scmp.ge.s32.totalorder %s1632_s12, 1  ;;  %s1632_s12 = sphi %s1654_s12, %s13_s12  }
   0x2   : > { %p138_p1 = scmp.lt.s32.totalorder %s1632_s12, 3 }
   0x4   : > { %p139_p2 = pnand %p1600_p0, %p138_p1 }
   0x6   : > { %142 = sbr.rel (%p139_p2) target bundleno = 549 (0x225), region = 32 }
   0xb   : > { %v210_v0 = vld [vmem:[%s2554_s1 + $0x20] sm:$0xf]  ;;  %vm312_vm0 = vcmask 1043456   ;;  %v209_v1 = vld [vmem:[%s2554_s1 + $0x18] sm:$0xff]  ;;  %v208_v2 = vld [vmem:[%s2554_s1 + $0x10] sm:$0xff]  ;;  %s1601_s20 = sshll.u32 %s1596_s13, 5 }
   0xc   : > { %v314_v3 = vsel %vm312_vm0, %v210_v0, 0  ;;  %v1671_v4 = vand.u32 4294901760, %v209_v1  ;;  %v1673_v5 = vand.u32 4294901760, %v208_v2  ;;  %v207_v6 = vld [vmem:[%s2554_s1 + $0x8] sm:$0xff]  ;;  %v206_v7 = vld [vmem:[%s2554_s1] sm:$0xff]  ;;  %p163_p3 = scmp.lt.s32.totalorder %s1601_s20, 63 }
   0xd   : > { %v1681_v8 = vand.u32 4294901760, %v314_v3  ;;  %v1683_v9 = vand.u32 4294901760, %v207_v6  ;;  %v1685_v10 = vand.u32 4294901760, %v206_v7  ;;  %vm215_vm1 = vcmask 293888  }
   0xe   : > { %v1688_v11 = vsub.f32 %v209_v1, %v1671_v4  ;;  %v1691_v12 = vsub.f32 %v208_v2, %v1673_v5  ;;  %s2700_s20 = smov (!%p163_p3, %s1601_s20), 63  ;;  %vm1507_vm2 = vcmask 31744  }
   0xf   : > { %1607 = vmatpush.msra.mxu2 %v1681_v8  ;;  %v606_v13 = vsub.f32 %v314_v3, %v1681_v8  ;;  %v1698_v14 = vsub.f32 %v207_v6, %v1683_v9  ;;  %328 = vmatpush.msra.mxu0 %v1681_v8  ;;  %v1702_v15 = vsub.f32 %v206_v7, %v1685_v10  ;;  %s1602_s25 = sshll.u32 %s2700_s20, 3 }
  0x10   : > { %v613_v16 = vand.u32 4294901760, %v1688_v11  ;;  %v619_v17 = vand.u32 4294901760, %v1691_v12  ;;  %s1714_s28 = scalar_lea.vmem %s2553_s0, %s1602_s25  ;;  %s2354_s6 = scalar_lea.vmem %s2556_s3, %s1602_s25 }
  0x11   : > { %1608 = vmatpush.msra.mxu2 %v1671_v4  ;;  %v607_v18 = vand.u32 4294901760, %v606_v13  ;;  %v625_v19 = vand.u32 4294901760, %v1698_v14  ;;  %v631_v20 = vand.u32 4294901760, %v1702_v15  ;;  %330 = vmatpush.msra.mxu0 %v1671_v4  ;;  %v190_v23 = vld [vmem:[%s1714_s28 + $0x80] sm:$0xff]  ;;  %v191_v24 = vld [vmem:[%s1714_s28 + $0x88] sm:$0xff]  ;;  %v192_v32 = vld [vmem:[%s1714_s28 + $0x90] sm:$0xff] }
  0x12   : > { %v614_v21 = vsub.f32 %v1688_v11, %v613_v16  ;;  %v620_v22 = vsub.f32 %v1691_v12, %v619_v17  ;;  %v265_v26 = vsel %vm215_vm1, %v190_v23, 0  ;;  %v174_v27 = vld [vmem:[%s1714_s28] sm:$0xff]  ;;  %v175_v28 = vld [vmem:[%s1714_s28 + $0x8] sm:$0xff]  ;;  %v268_v31 = vsel %vm215_vm1, %v191_v24, 0  ;;  %v176_v45 = vld [vmem:[%s1714_s28 + $0x10] sm:$0xff] }
  0x13   : > { %v608_v25 = vsub.f32 %v606_v13, %v607_v18  ;;  %1609 = vmatpush.msra.mxu2 %v1673_v5  ;;  %332 = vmatpush.msra.mxu0 %v1673_v5  ;;  %v626_v29 = vsub.f32 %v1698_v14, %v625_v19  ;;  %v1732_v30 = vand.u32 4294901760, %v265_v26  ;;  %v632_v35 = vsub.f32 %v1702_v15, %v631_v20  ;;  %v193_v57 = vld [vmem:[%s1714_s28 + $0x98] sm:$0xff]  ;;  %v195_v24 = vld [vmem:[%s1714_s28 + $0xa8] sm:$0xff] }
  0x14   : > { %v615_v34 = vand.u32 4294901760, %v614_v21  ;;  %v1741_v36 = vand.u32 4294901760, %v268_v31  ;;  %v621_v37 = vand.u32 4294901760, %v620_v22  ;;  %v217_v39 = vsel %vm215_vm1, %v174_v27, 0  ;;  %v177_v1 = vld [vmem:[%s1714_s28 + $0x18] sm:$0xff] }
  0x15   : > { %v609_v33 = vand.u32 4294901760, %v608_v25  ;;  %1610 = vmatpush.msra.mxu2 %v1683_v9  ;;  %334 = vmatpush.msra.mxu0 %v1683_v9  ;;  %v1744_v38 = vsub.f32 %v265_v26, %v1732_v30  ;;  %v220_v40 = vsel %vm215_vm1, %v175_v28, 0  ;;  %v1752_v42 = vand.u32 4294901760, %v217_v39 }
  0x16   : > { %v1750_v41 = vsub.f32 %v268_v31, %v1741_v36  ;;  %v271_v43 = vsel %vm215_vm1, %v192_v32, 0  ;;  %v1755_v44 = vand.u32 4294901760, %v220_v40  ;;  %v627_v47 = vand.u32 4294901760, %v626_v29  ;;  %v179_v31 = vld [vmem:[%s1714_s28 + $0x28] sm:$0xff] }
  0x17   : > { %1612 = vmatpush.msra.mxu3 %v609_v33  ;;  %1611 = vmatpush.msra.mxu2 %v1685_v10  ;;  %v2565_v46 = vand.u32 4294901760, %v1744_v38  ;;  %v1761_v48 = vsub.f32 %v217_v39, %v1752_v42  ;;  %v1770_v52 = vand.u32 4294901760, %v271_v43  ;;  %v223_v53 = vsel %vm215_vm1, %v176_v45, 0  ;;  %v196_v39 = vld [vmem:[%s1714_s28 + $0xb0] sm:$0xff] }
  0x18   : > { %610 = vmatpush.msra.mxu1 %v609_v33  ;;  %336 = vmatpush.msra.mxu0 %v1685_v10  ;;  %v1764_v49 = vsub.f32 %v220_v40, %v1755_v44  ;;  %v2564_v51 = vand.u32 4294901760, %v1750_v41  ;;  %v633_v54 = vand.u32 4294901760, %v632_v35  ;;  %v1780_v60 = vand.u32 4294901760, %v223_v53 }
  0x19   : > { %777 = vmatpush.msrb.mxu2 %v606_v13  ;;  %1613 = vmatpush.msra.mxu3 %v615_v34  ;;  %v468_v50 = vsub.f32 %v1744_v38, %v2565_v46  ;;  %v2579_v55 = vand.u32 4294901760, %v1761_v48  ;;  %v1787_v62 = vsub.f32 %v271_v43, %v1770_v52  ;;  %v274_v0 = vsel %vm215_vm1, %v193_v57, 0  ;;  %v194_v13 = vld [vmem:[%s1714_s28 + $0xa0] sm:$0xff]  ;;  %v185_v46 = vld [vmem:[%s1714_s28 + $0x58] sm:$0xff] }
  0x1a   : > { %616 = vmatpush.msra.mxu1 %v615_v34  ;;  %1179 = vmatpush.msrb.mxu0 %v607_v18  ;;  %v2577_v59 = vand.u32 4294901760, %v1764_v49  ;;  %v476_v61 = vsub.f32 %v1750_v41, %v2564_v51  ;;  %v1799_v3 = vsub.f32 %v223_v53, %v1780_v60  ;;  %v280_v29 = vsel %vm215_vm1, %v195_v24, 0 }
  0x1b   : > { %1614 = vmatpush.msra.mxu3 %v621_v37  ;;  %780 = vmatpush.msrb.mxu2 %v1688_v11  ;;  %v469_v56 = vand.u32 4294901760, %v468_v50  ;;  %v340_v58 = vsub.f32 %v1761_v48, %v2579_v55  ;;  %v2563_v7 = vand.u32 4294901760, %v1787_v62  ;;  %v1803_v11 = vand.u32 4294901760, %v274_v0  ;;  %v204_v55 = vld [vmem:[%s1714_s28 + $0xf0] sm:$0xff] }
  0x1c   : > { %622 = vmatpush.msra.mxu1 %v621_v37  ;;  %1183 = vmatpush.msrb.mxu0 %v613_v16  ;;  %v348_v2 = vsub.f32 %v1764_v49, %v2577_v59  ;;  %v477_v6 = vand.u32 4294901760, %v476_v61  ;;  %v1866_v35 = vand.u32 4294901760, %v280_v29  ;;  %v232_v37 = vsel %vm215_vm1, %v179_v31, 0  ;;  %v187_v59 = vld [vmem:[%s1714_s28 + $0x68] sm:$0xff] }
  0x1d   : > { %1615 = vmatpush.msra.mxu3 %v627_v47  ;;  %783 = vmatpush.msrb.mxu2 %v1691_v12  ;;  %v341_v63 = vand.u32 4294901760, %v340_v58  ;;  %v226_v12 = vsel %vm215_vm1, %v177_v1, 0  ;;  %v1822_v21 = vsub.f32 %v274_v0, %v1803_v11  ;;  %v1871_v45 = vand.u32 4294901760, %v232_v37  ;;  %v197_v1 = vld [vmem:[%s1714_s28 + $0xb8] sm:$0xff] }
  0x1e   : > { %470 = vmatmul.f32.vlgmr.msra.gmra.mxu2 %v469_v56  ;;  %628 = vmatpush.msra.mxu1 %v627_v47  ;;  %v349_v16 = vand.u32 4294901760, %v348_v2  ;;  %v1814_v18 = vand.u32 4294901760, %v226_v12  ;;  %v1877_v50 = vsub.f32 %v280_v29, %v1866_v35  ;;  %v283_v53 = vsel %vm215_vm1, %v196_v39, 0 }
  0x1f   : > { %1616 = vmatpush.msra.mxu3 %v633_v54  ;;  %1187 = vmatpush.msrb.mxu0 %v619_v17  ;;  %v2575_v17 = vand.u32 4294901760, %v1799_v3  ;;  %v1886_v57 = vsub.f32 %v232_v37, %v1871_v45 }
  0x20   : > { %700 = vmatmul.f32.vlgmr.msra.gmra.mxu3 %v1732_v30  ;;  %634 = vmatpush.msra.mxu1 %v633_v54  ;;  %v1835_v22 = vsub.f32 %v226_v12, %v1814_v18  ;;  %v180_v54 = vld [vmem:[%s1714_s28 + $0x30] sm:$0xff]  ;;  %v2559_v61 = vand.u32 4294901760, %v1877_v50 }
  0x21   : > { %963 = vmatpush.msrb.mxu3 %v1681_v8  ;;  %342 = vmatmul.f32.vlgmr.msra.gmra.mxu0 %v341_v63  ;;  %v1890_v63 = vand.u32 4294901760, %v283_v53  ;;  %v235_v0 = vsel %vm215_vm1, %v180_v54, 0 }
  0x22   : > { %636 = vmatmul.f32.vlgmr.msra.gmra.mxu1 %v1752_v42  ;;  %786 = vmatpush.msrb.mxu2 %v1698_v14  ;;  %v277_v14 = vsel %vm215_vm1, %v194_v13, 0  ;;  %v2574_v26 = vand.u32 4294901760, %v1835_v22  ;;  %v1895_v12 = vand.u32 4294901760, %v235_v0  ;;  %v508_v13 = vsub.f32 %v1877_v50, %v2559_v61  ;;  %v184_v61 = vld [vmem:[%s1714_s28 + $0x50] sm:$0xff] }
  0x23   : > { %1337 = vmatpush.msrb.mxu1 %v1681_v8  ;;  %965 = vmatpush.msrb.mxu3 %v1671_v4  ;;  %v484_v8 = vsub.f32 %v1787_v62, %v2563_v7 }
  0x24   : > { %1191 = vmatpush.msrb.mxu0 %v625_v19  ;;  %789 = vmatpush.msrb.mxu2 %v1702_v15  ;;  %v178_v19 = vld [vmem:[%s1714_s28 + $0x20] sm:$0xff] }
  0x25   : > { %1339 = vmatpush.msrb.mxu1 %v1671_v4  ;;  %967 = vmatpush.msrb.mxu3 %v1673_v5  ;;  %v356_v4 = vsub.f32 %v1799_v3, %v2575_v17  ;;  %v485_v15 = vand.u32 4294901760, %v484_v8  ;;  %v229_v23 = vsel %vm215_vm1, %v178_v19, 0  ;;  %v286_v8 = vsel %vm215_vm1, %v197_v1, 0  ;;  %v199_v1 = vld [vmem:[%s1714_s28 + $0xc8] sm:$0xff] }
  0x26   : > { %478 = vmatmul.f32.gmra.mxu2 %v477_v6  ;;  %1195 = vmatpush.msrb.mxu0 %v631_v20  ;;  %v1840_v20 = vand.u32 4294901760, %v277_v14  ;;  %v2571_v6 = vand.u32 4294901760, %v1886_v57  ;;  %v1914_v24 = vand.u32 4294901760, %v286_v8 }
  0x27   : > { %1341 = vmatpush.msrb.mxu1 %v1673_v5  ;;  %969 = vmatpush.msrb.mxu3 %v1683_v9  ;;  %v2562_v5 = vand.u32 4294901760, %v1822_v21  ;;  %v357_v25 = vand.u32 4294901760, %v356_v4  ;;  %v1910_v4 = vsub.f32 %v235_v0, %v1895_v12 }
  0x28   : > { %704 = vmatmul.f32.gmra.mxu3 %v1741_v36  ;;  %v1853_v28 = vsub.f32 %v277_v14, %v1840_v20  ;;  %v181_v14 = vld [vmem:[%s1714_s28 + $0x38] sm:$0xff]  ;;  %v380_v19 = vsub.f32 %v1886_v57, %v2571_v6  ;;  %v1925_v37 = vsub.f32 %v286_v8, %v1914_v24  ;;  %v186_v6 = vld [vmem:[%s1714_s28 + $0x60] sm:$0xff] }
  0x29   : > { %350 = vmatmul.f32.gmra.mxu0 %v349_v16  ;;  %1343 = vmatpush.msrb.mxu1 %v1683_v9  ;;  %v1847_v9 = vand.u32 4294901760, %v229_v23  ;;  %v492_v27 = vsub.f32 %v1822_v21, %v2562_v5  ;;  %v1901_v16 = vsub.f32 %v283_v53, %v1890_v63  ;;  %v2569_v31 = vand.u32 4294901760, %v1910_v4 }
  0x2a   : > { %640 = vmatmul.f32.gmra.mxu1 %v1755_v44  ;;  %971 = vmatpush.msrb.mxu3 %v1685_v10  ;;  %v2561_v34 = vand.u32 4294901760, %v1853_v28  ;;  %v381_v29 = vand.u32 4294901760, %v380_v19 }
  0x2b   : > { %1345 = vmatpush.msrb.mxu1 %v1685_v10  ;;  %v364_v10 = vsub.f32 %v1835_v22, %v2574_v26  ;;  %v1862_v32 = vsub.f32 %v229_v23, %v1847_v9  ;;  %v493_v33 = vand.u32 4294901760, %v492_v27  ;;  %v2558_v23 = vand.u32 4294901760, %v1901_v16  ;;  %v198_v27 = vld [vmem:[%s1714_s28 + $0xc0] sm:$0xff] }
  0x2c   : > { %v500_v47 = vsub.f32 %v1853_v28, %v2561_v34  ;;  %v289_v39 = vsel %vm215_vm1, %v198_v27, 0  ;;  %v201_v34 = vld [vmem:[%s1714_s28 + $0xd8] sm:$0xff] }
  0x2d   : > { %v365_v40 = vand.u32 4294901760, %v364_v10  ;;  %v2573_v43 = vand.u32 4294901760, %v1862_v32  ;;  %v298_v51 = vsel %vm215_vm1, %v201_v34, 0  ;;  %v250_v34 = vsel %vm215_vm1, %v185_v46, 0 }
  0x2e   : > { %486 = vmatmul.f32.gmra.mxu2 %v485_v15  ;;  %v501_v58 = vand.u32 4294901760, %v500_v47  ;;  %v509_v15 = vand.u32 4294901760, %v508_v13  ;;  %v388_v47 = vsub.f32 %v1910_v4, %v2569_v31  ;;  %v2015_v31 = vand.u32 4294901760, %v250_v34 }
  0x2f   : > { %v372_v56 = vsub.f32 %v1862_v32, %v2573_v43  ;;  %v203_v43 = vld [vmem:[%s1714_s28 + $0xe8] sm:$0xff] }
  0x30   : > { %708 = vmatmul.f32.gmra.mxu3 %v1770_v52 }
  0x31   : > { %358 = vmatmul.f32.gmra.mxu0 %v357_v25  ;;  %v373_v2 = vand.u32 4294901760, %v372_v56  ;;  %v238_v25 = vsel %vm215_vm1, %v181_v14, 0  ;;  %v2557_v56 = vand.u32 4294901760, %v1925_v37 }
  0x32   : > { %644 = vmatmul.f32.gmra.mxu1 %v1780_v60  ;;  %v1919_v10 = vand.u32 4294901760, %v238_v25 }
  0x33   : > { %v524_v14 = vsub.f32 %v1925_v37, %v2557_v56 }
  0x34   : > { %v1934_v53 = vsub.f32 %v238_v25, %v1919_v10  ;;  %v183_v25 = vld [vmem:[%s1714_s28 + $0x48] sm:$0xff] }
  0x36   : > { %494 = vmatmul.f32.gmra.mxu2 %v493_v33  ;;  %v516_v33 = vsub.f32 %v1901_v16, %v2558_v23  ;;  %v2568_v13 = vand.u32 4294901760, %v1934_v53 }
  0x38   : > { %712 = vmatmul.f32.gmra.mxu3 %v1803_v11  ;;  %v517_v54 = vand.u32 4294901760, %v516_v33  ;;  %v396_v27 = vsub.f32 %v1934_v53, %v2568_v13  ;;  %v525_v33 = vand.u32 4294901760, %v524_v14 }
  0x39   : > { %366 = vmatmul.f32.gmra.mxu0 %v365_v40  ;;  %v182_v40 = vld [vmem:[%s1714_s28 + $0x40] sm:$0xff] }
  0x3a   : > { %648 = vmatmul.f32.gmra.mxu1 %v1814_v18  ;;  %v241_v0 = vsel %vm215_vm1, %v182_v40, 0 }
  0x3b   : > { %v1943_v8 = vand.u32 4294901760, %v241_v0 }
  0x3e   : > { %502 = vmatmul.f32.gmra.mxu2 %v501_v58  ;;  %v1938_v58 = vand.u32 4294901760, %v289_v39 }
  0x40   : > { %716 = vmatmul.f32.gmra.mxu3 %v1840_v20  ;;  %2611 = vst [vmem:[#allocation2_spill] sm:$0xff] %v1938_v58  ;;  %v1949_v19 = vsub.f32 %v289_v39, %v1938_v58 }
  0x41   : > { %374 = vmatmul.f32.gmra.mxu0 %v373_v2  ;;  %v389_v2 = vand.u32 4294901760, %v388_v47  ;;  %v244_v47 = vsel %vm215_vm1, %v183_v25, 0 }
  0x42   : > { %652 = vmatmul.f32.gmra.mxu1 %v1847_v9  ;;  %v2560_v39 = vand.u32 4294901760, %v1949_v19  ;;  %v1967_v56 = vand.u32 4294901760, %v244_v47 }
  0x46   : > { %510 = vmatmul.f32.gmra.mxu2 %v509_v15  ;;  %v292_v15 = vsel %vm215_vm1, %v199_v1, 0  ;;  %v397_v1 = vand.u32 4294901760, %v396_v27  ;;  %v1982_v27 = vsub.f32 %v244_v47, %v1967_v56 }
  0x47   : > { %v1962_v40 = vand.u32 4294901760, %v292_v15 }
  0x48   : > { %720 = vmatmul.f32.gmra.mxu3 %v1866_v35 }
  0x49   : > { %382 = vmatmul.f32.gmra.mxu0 %v381_v29  ;;  %v1958_v29 = vsub.f32 %v241_v0, %v1943_v8  ;;  %2612 = vst [vmem:[#allocation3_spill] sm:$0xff] %v1962_v40  ;;  %v532_v0 = vsub.f32 %v1949_v19, %v2560_v39  ;;  %v1973_v14 = vsub.f32 %v292_v15, %v1962_v40 }
  0x4a   : > { %656 = vmatmul.f32.gmra.mxu1 %v1871_v45 }
  0x4b   : > { %2613 = vst [vmem:[#allocation4_spill] sm:$0xff] %v1973_v14  ;;  %v2566_v15 = vand.u32 4294901760, %v1973_v14 }
  0x4d   : > { %v540_v47 = vsub.f32 %v1973_v14, %v2566_v15  ;;  %v2010_v15 = vand.u32 4294901760, %v298_v51  ;;  %v189_v14 = vld [vmem:[%s1714_s28 + $0x78] sm:$0xff] }
  0x4e   : > { %518 = vmatmul.f32.gmra.mxu2 %v517_v54  ;;  %v200_v54 = vld [vmem:[%s1714_s28 + $0xd0] sm:$0xff] }
  0x4f   : > { %v295_v23 = vsel %vm215_vm1, %v200_v54, 0  ;;  %v247_v54 = vsel %vm215_vm1, %v184_v61, 0  ;;  %2616 = vst [vmem:[#allocation7_spill] sm:$0xff] %v2010_v15 }
  0x50   : > { %724 = vmatmul.f32.gmra.mxu3 %v1890_v63  ;;  %v1986_v39 = vand.u32 4294901760, %v295_v23  ;;  %v1991_v7 = vand.u32 4294901760, %v247_v54 }
  0x51   : > { %390 = vmatmul.f32.gmra.mxu0 %v389_v2  ;;  %v2567_v2 = vand.u32 4294901760, %v1958_v29 }
  0x52   : > { %660 = vmatmul.f32.gmra.mxu1 %v1895_v12  ;;  %2614 = vst [vmem:[#allocation5_spill] sm:$0xff] %v1986_v39 }
  0x53   : > { %v404_v25 = vsub.f32 %v1958_v29, %v2567_v2  ;;  %v202_v2 = vld [vmem:[%s1714_s28 + $0xe0] sm:$0xff] }
  0x55   : > { %v405_v5 = vand.u32 4294901760, %v404_v25  ;;  %v2006_v25 = vsub.f32 %v247_v54, %v1991_v7 }
  0x56   : > { %526 = vmatmul.f32.gmra.mxu2 %v525_v33  ;;  %v533_v33 = vand.u32 4294901760, %v532_v0  ;;  %v1997_v0 = vsub.f32 %v295_v23, %v1986_v39 }
  0x58   : > { %728 = vmatmul.f32.gmra.mxu3 %v1914_v24  ;;  %2615 = vst [vmem:[#allocation6_spill] sm:$0xff] %v1997_v0  ;;  %v2572_v23 = vand.u32 4294901760, %v1997_v0 }
  0x59   : > { %398 = vmatmul.f32.gmra.mxu0 %v397_v1  ;;  %v2570_v1 = vand.u32 4294901760, %v1982_v27 }
  0x5a   : > { %664 = vmatmul.f32.gmra.mxu1 %v1919_v10  ;;  %v548_v54 = vsub.f32 %v1997_v0, %v2572_v23  ;;  %v188_v0 = vld [vmem:[%s1714_s28 + $0x70] sm:$0xff] }
  0x5b   : > { %v412_v61 = vsub.f32 %v1982_v27, %v2570_v1  ;;  %v301_v1 = vsel %vm215_vm1, %v202_v2, 0  ;;  %v253_v2 = vsel %vm215_vm1, %v186_v6, 0 }
  0x5c   : > { %v2034_v23 = vand.u32 4294901760, %v301_v1  ;;  %v2039_v17 = vand.u32 4294901760, %v253_v2 }
  0x5d   : > { %v413_v13 = vand.u32 4294901760, %v412_v61  ;;  %v2030_v61 = vsub.f32 %v250_v34, %v2015_v31 }
  0x5e   : > { %534 = vmatmul.f32.gmra.mxu2 %v533_v33  ;;  %v541_v33 = vand.u32 4294901760, %v540_v47  ;;  %v2021_v47 = vsub.f32 %v298_v51, %v2010_v15  ;;  %2618 = vst [vmem:[#allocation9_spill] sm:$0xff] %v2034_v23 }
  0x60   : > { %732 = vmatmul.f32.gmra.mxu3 %v1938_v58  ;;  %2617 = vst [vmem:[#allocation8_spill] sm:$0xff] %v2021_v47  ;;  %v2578_v51 = vand.u32 4294901760, %v2021_v47 }
  0x61   : > { %406 = vmatmul.f32.gmra.mxu0 %v405_v5  ;;  %v2576_v5 = vand.u32 4294901760, %v2006_v25 }
  0x62   : > { %668 = vmatmul.f32.gmra.mxu1 %v1943_v8  ;;  %v556_v34 = vsub.f32 %v2021_v47, %v2578_v51 }
  0x63   : > { %v420_v46 = vsub.f32 %v2006_v25, %v2576_v5  ;;  %v304_v5 = vsel %vm215_vm1, %v203_v43, 0  ;;  %v256_v43 = vsel %vm215_vm1, %v187_v59, 0 }
  0x64   : > { %v2058_v51 = vand.u32 4294901760, %v304_v5 }
  0x65   : > { %v421_v26 = vand.u32 4294901760, %v420_v46  ;;  %v2054_v46 = vsub.f32 %v253_v2, %v2039_v17 }
  0x66   : > { %542 = vmatmul.f32.gmra.mxu2 %v541_v33  ;;  %v549_v33 = vand.u32 4294901760, %v548_v54  ;;  %v2045_v54 = vsub.f32 %v301_v1, %v2034_v23 }
  0x68   : > { %736 = vmatmul.f32.gmra.mxu3 %v1962_v40  ;;  %2619 = vst [vmem:[#allocation10_spill] sm:$0xff] %v2045_v54  ;;  %v2587_v1 = vand.u32 4294901760, %v2045_v54 }
  0x69   : > { %414 = vmatmul.f32.gmra.mxu0 %v413_v13  ;;  %v2584_v13 = vand.u32 4294901760, %v2030_v61 }
  0x6a   : > { %672 = vmatmul.f32.gmra.mxu1 %v1967_v56  ;;  %v564_v2 = vsub.f32 %v2045_v54, %v2587_v1  ;;  %v205_v54 = vld [vmem:[%s1714_s28 + $0xf8] sm:$0xff] }
  0x6b   : > { %v428_v6 = vsub.f32 %v2030_v61, %v2584_v13  ;;  %v307_v13 = vsel %vm215_vm1, %v204_v55, 0  ;;  %v259_v55 = vsel %vm215_vm1, %v188_v0, 0 }
  0x6c   : > { %v2082_v1 = vand.u32 4294901760, %v307_v13  ;;  %v2087_v40 = vand.u32 4294901760, %v259_v55 }
  0x6d   : > { %v429_v47 = vand.u32 4294901760, %v428_v6 }
  0x6e   : > { %550 = vmatmul.f32.gmra.mxu2 %v549_v33  ;;  %v557_v33 = vand.u32 4294901760, %v556_v34  ;;  %v2069_v34 = vsub.f32 %v304_v5, %v2058_v51 }
  0x70   : > { %740 = vmatmul.f32.gmra.mxu3 %v1986_v39  ;;  %v2063_v39 = vand.u32 4294901760, %v256_v43  ;;  %2620 = vst [vmem:[#allocation11_spill] sm:$0xff] %v2069_v34  ;;  %v2597_v5 = vand.u32 4294901760, %v2069_v34 }
  0x71   : > { %422 = vmatmul.f32.gmra.mxu0 %v421_v26  ;;  %v2594_v26 = vand.u32 4294901760, %v2054_v46 }
  0x72   : > { %676 = vmatmul.f32.gmra.mxu1 %v1991_v7  ;;  %v2078_v6 = vsub.f32 %v256_v43, %v2063_v39  ;;  %v572_v43 = vsub.f32 %v2069_v34, %v2597_v5 }
  0x73   : > { %v436_v59 = vsub.f32 %v2054_v46, %v2594_v26  ;;  %v310_v26 = vsel %vm215_vm1, %v205_v54, 0  ;;  %v262_v54 = vsel %vm215_vm1, %v189_v14, 0 }
  0x76   : > { %558 = vmatmul.f32.gmra.mxu2 %v557_v33  ;;  %v565_v33 = vand.u32 4294901760, %v564_v2  ;;  %v2093_v2 = vsub.f32 %v307_v13, %v2082_v1  ;;  %v2106_v13 = vand.u32 4294901760, %v310_v26 }
  0x78   : > { %744 = vmatmul.f32.gmra.mxu3 %v2010_v15  ;;  %v437_v15 = vand.u32 4294901760, %v436_v59  ;;  %v2102_v59 = vsub.f32 %v259_v55, %v2087_v40  ;;  %v2605_v5 = vand.u32 4294901760, %v2093_v2  ;;  %2621 = vst [vmem:[#allocation12_spill] sm:$0xff] %v2106_v13 }
  0x79   : > { %430 = vmatmul.f32.gmra.mxu0 %v429_v47  ;;  %v2602_v47 = vand.u32 4294901760, %v2078_v6 }
  0x7a   : > { %680 = vmatmul.f32.gmra.mxu1 %v2015_v31  ;;  %v580_v55 = vsub.f32 %v2093_v2, %v2605_v5 }
  0x7b   : > { %v444_v0 = vsub.f32 %v2078_v6, %v2602_v47 }
  0x7c   : > { %v581_v47 = vand.u32 4294901760, %v580_v55 }
  0x7d   : > { %v445_v34 = vand.u32 4294901760, %v444_v0 }
  0x7e   : > { %566 = vmatmul.f32.gmra.mxu2 %v565_v33  ;;  %v573_v33 = vand.u32 4294901760, %v572_v43  ;;  %v2116_v43 = vsub.f32 %v310_v26, %v2106_v13 }
  0x80   : > { %748 = vmatmul.f32.gmra.mxu3 %v2034_v23  ;;  %v2608_v23 = vand.u32 4294901760, %v2102_v59 }
  0x81   : > { %438 = vmatmul.f32.gmra.mxu0 %v437_v15  ;;  %v2110_v15 = vand.u32 4294901760, %v262_v54 }
  0x82   : > { %684 = vmatmul.f32.gmra.mxu1 %v2039_v17  ;;  %v452_v14 = vsub.f32 %v2102_v59, %v2608_v23 }
  0x83   : > { %v2123_v0 = vsub.f32 %v262_v54, %v2110_v15 }
  0x84   : > { %v453_v58 = vand.u32 4294901760, %v452_v14 }
  0x85   : > { %v2607_v5 = vand.u32 4294901760, %v2123_v0 }
  0x86   : > { %574 = vmatmul.f32.gmra.mxu2 %v573_v33  ;;  %v2606_v33 = vand.u32 4294901760, %v2116_v43 }
  0x88   : > { %752 = vmatmul.f32.gmra.mxu3 %v2058_v51  ;;  %v588_v26 = vsub.f32 %v2116_v43, %v2606_v33 }
  0x89   : > { %446 = vmatmul.f32.gmra.mxu0 %v445_v34  ;;  %v460_v34 = vsub.f32 %v2123_v0, %v2607_v5 }
  0x8a   : > { %688 = vmatmul.f32.gmra.mxu1 %v2063_v39  ;;  %v589_v54 = vand.u32 4294901760, %v588_v26  ;;  %v2622_v26 = vand.u32 4294901760, %v1761_v48 }
  0x8b   : > { %v461_v55 = vand.u32 4294901760, %v460_v34 }
  0x8e   : > { %582 = vmatmul.f32.gmra.mxu2 %v581_v47 }
  0x90   : > { %756 = vmatmul.f32.gmra.mxu3 %v2082_v1 }
  0x91   : > { %454 = vmatmul.f32.gmra.mxu0 %v453_v58  ;;  %v2142_v58 = vld [vmem:[%s2555_s2] ss:$0 sm:$0xff] }
  0x92   : > { %692 = vmatmul.f32.gmra.mxu1 %v2087_v40 }
  0x96   : > { %590 = vmatmul.f32.gmra.mxu2 %v589_v54 }
  0x98   : > { %760 = vmatmul.f32.gmra.mxu3 %v2106_v13  ;;  %v2624_v13 = vand.u32 4294901760, %v1764_v49 }
  0x99   : > { %462 = vmatmul.f32.gmra.mxu0 %v461_v55 }
  0x9a   : > { %696 = vmatmul.f32.gmra.mxu1 %v2110_v15 }
  0x9e   : > { %792 = vmatmul.f32.vlgmr.msrb.gmra.mxu2 %v1761_v48  ;;  %v2144_v47 = vpop.f32.mrf.mxu0 }
  0x9f   : > { %v2146_v14 = vpop.f32.mrf.mxu1 }
  0xa0   : > { %975 = vmatmul.f32.vlgmr.msrb.gmra.mxu3 %v2622_v26 }
  0xa1   : > { %v471_v34 = vpop.f32.mrf.mxu2  ;;  %1197 = vmatmul.f32.vlgmr.msrb.gmra.mxu0 %v1752_v42 }
  0xa2   : > { %v472_v54 = vadd.f32 %v2142_v58, %v471_v34  ;;  %1347 = vmatmul.f32.vlgmr.msrb.gmra.mxu1 %v1752_v42 }
  0xa3   : > { %v701_v55 = vpop.f32.mrf.mxu3 }
  0xa4   : > { %v2153_v33 = vadd.f32 %v701_v55, %v472_v54 }
  0xa6   : > { %2623 = vst [vmem:[#allocation13_spill] sm:$0xff] %v2153_v33  ;;  %797 = vmatmul.f32.gmra.mxu2 %v1764_v49  ;;  %v2156_v5 = vpop.f32.mrf.mxu0  ;;  %v2626_v33 = vand.u32 4294901760, %v1799_v3 }
  0xa7   : > { %v2158_v23 = vpop.f32.mrf.mxu1 }
  0xa8   : > { %981 = vmatmul.f32.gmra.mxu3 %v2624_v13 }
  0xa9   : > { %v479_v48 = vpop.f32.mrf.mxu2  ;;  %1201 = vmatmul.f32.gmra.mxu0 %v1755_v44 }
  0xaa   : > { %v480_v26 = vadd.f32 %v2142_v58, %v479_v48  ;;  %1351 = vmatmul.f32.gmra.mxu1 %v1755_v44 }
  0xab   : > { %v705_v42 = vpop.f32.mrf.mxu3 }
  0xac   : > { %v2165_v34 = vadd.f32 %v705_v42, %v480_v26 }
  0xae   : > { %2625 = vst [vmem:[#allocation14_spill] sm:$0xff] %v2165_v34  ;;  %802 = vmatmul.f32.gmra.mxu2 %v1799_v3  ;;  %v2168_v54 = vpop.f32.mrf.mxu0  ;;  %v2628_v34 = vand.u32 4294901760, %v1835_v22 }
  0xaf   : > { %v2170_v55 = vpop.f32.mrf.mxu1 }
  0xb0   : > { %987 = vmatmul.f32.gmra.mxu3 %v2626_v33 }
  0xb1   : > { %v487_v49 = vpop.f32.mrf.mxu2  ;;  %1205 = vmatmul.f32.gmra.mxu0 %v1780_v60 }
  0xb2   : > { %v488_v13 = vadd.f32 %v2142_v58, %v487_v49  ;;  %1355 = vmatmul.f32.gmra.mxu1 %v1780_v60 }
  0xb3   : > { %v709_v44 = vpop.f32.mrf.mxu3 }
  0xb4   : > { %v2177_v48 = vadd.f32 %v709_v44, %v488_v13 }
  0xb6   : > { %2627 = vst [vmem:[#allocation15_spill] sm:$0xff] %v2177_v48  ;;  %807 = vmatmul.f32.gmra.mxu2 %v1835_v22  ;;  %v2180_v26 = vpop.f32.mrf.mxu0  ;;  %v2630_v48 = vand.u32 4294901760, %v1862_v32 }
  0xb7   : > { %v2182_v42 = vpop.f32.mrf.mxu1 }
  0xb8   : > { %993 = vmatmul.f32.gmra.mxu3 %v2628_v34 }
  0xb9   : > { %v495_v3 = vpop.f32.mrf.mxu2  ;;  %1209 = vmatmul.f32.gmra.mxu0 %v1814_v18 }
  0xba   : > { %v496_v33 = vadd.f32 %v2142_v58, %v495_v3  ;;  %1359 = vmatmul.f32.gmra.mxu1 %v1814_v18 }
  0xbb   : > { %v713_v60 = vpop.f32.mrf.mxu3 }
  0xbc   : > { %v2189_v49 = vadd.f32 %v713_v60, %v496_v33 }
  0xbe   : > { %2629 = vst [vmem:[#allocation16_spill] sm:$0xff] %v2189_v49  ;;  %812 = vmatmul.f32.gmra.mxu2 %v1862_v32  ;;  %v2192_v13 = vpop.f32.mrf.mxu0  ;;  %v2632_v49 = vand.u32 4294901760, %v1886_v57 }
  0xbf   : > { %v2194_v44 = vpop.f32.mrf.mxu1 }
  0xc0   : > { %999 = vmatmul.f32.gmra.mxu3 %v2630_v48 }
  0xc1   : > { %v503_v22 = vpop.f32.mrf.mxu2  ;;  %1213 = vmatmul.f32.gmra.mxu0 %v1847_v9 }
  0xc2   : > { %v504_v34 = vadd.f32 %v2142_v58, %v503_v22  ;;  %1363 = vmatmul.f32.gmra.mxu1 %v1847_v9 }
  0xc3   : > { %v717_v18 = vpop.f32.mrf.mxu3 }
  0xc4   : > { %v2201_v3 = vadd.f32 %v717_v18, %v504_v34 }
  0xc6   : > { %2631 = vst [vmem:[#allocation17_spill] sm:$0xff] %v2201_v3  ;;  %817 = vmatmul.f32.gmra.mxu2 %v1886_v57  ;;  %v2204_v33 = vpop.f32.mrf.mxu0  ;;  %v2634_v3 = vand.u32 4294901760, %v1910_v4 }
  0xc7   : > { %v2206_v60 = vpop.f32.mrf.mxu1 }
  0xc8   : > { %1005 = vmatmul.f32.gmra.mxu3 %v2632_v49 }
  0xc9   : > { %v511_v32 = vpop.f32.mrf.mxu2  ;;  %1217 = vmatmul.f32.gmra.mxu0 %v1871_v45 }
  0xca   : > { %v512_v48 = vadd.f32 %v2142_v58, %v511_v32  ;;  %1367 = vmatmul.f32.gmra.mxu1 %v1871_v45 }
  0xcb   : > { %v721_v9 = vpop.f32.mrf.mxu3 }
  0xcc   : > { %v2213_v22 = vadd.f32 %v721_v9, %v512_v48 }
  0xce   : > { %2633 = vst [vmem:[#allocation18_spill] sm:$0xff] %v2213_v22  ;;  %822 = vmatmul.f32.gmra.mxu2 %v1910_v4  ;;  %v2216_v34 = vpop.f32.mrf.mxu0  ;;  %v2636_v22 = vand.u32 4294901760, %v1934_v53 }
  0xcf   : > { %v2218_v18 = vpop.f32.mrf.mxu1 }
  0xd0   : > { %1011 = vmatmul.f32.gmra.mxu3 %v2634_v3 }
  0xd1   : > { %v519_v57 = vpop.f32.mrf.mxu2  ;;  %1221 = vmatmul.f32.gmra.mxu0 %v1895_v12 }
  0xd2   : > { %v520_v49 = vadd.f32 %v2142_v58, %v519_v57  ;;  %1371 = vmatmul.f32.gmra.mxu1 %v1895_v12 }
  0xd3   : > { %v725_v45 = vpop.f32.mrf.mxu3 }
  0xd4   : > { %v2225_v32 = vadd.f32 %v725_v45, %v520_v49 }
  0xd6   : > { %2635 = vst [vmem:[#allocation19_spill] sm:$0xff] %v2225_v32  ;;  %827 = vmatmul.f32.gmra.mxu2 %v1934_v53  ;;  %v2228_v48 = vpop.f32.mrf.mxu0  ;;  %v2638_v32 = vand.u32 4294901760, %v1958_v29 }
  0xd7   : > { %v2230_v9 = vpop.f32.mrf.mxu1 }
  0xd8   : > { %1017 = vmatmul.f32.gmra.mxu3 %v2636_v22 }
  0xd9   : > { %v527_v4 = vpop.f32.mrf.mxu2  ;;  %1225 = vmatmul.f32.gmra.mxu0 %v1919_v10 }
  0xda   : > { %v528_v3 = vadd.f32 %v2142_v58, %v527_v4  ;;  %1375 = vmatmul.f32.gmra.mxu1 %v1919_v10 }
  0xdb   : > { %v729_v12 = vpop.f32.mrf.mxu3 }
  0xdc   : > { %v2237_v57 = vadd.f32 %v729_v12, %v528_v3 }
  0xde   : > { %2637 = vst [vmem:[#allocation20_spill] sm:$0xff] %v2237_v57  ;;  %832 = vmatmul.f32.gmra.mxu2 %v1958_v29  ;;  %v2240_v49 = vpop.f32.mrf.mxu0  ;;  %v2640_v57 = vand.u32 4294901760, %v1982_v27 }
  0xdf   : > { %v2242_v45 = vpop.f32.mrf.mxu1 }
  0xe0   : > { %1023 = vmatmul.f32.gmra.mxu3 %v2638_v32 }
  0xe1   : > { %v535_v53 = vpop.f32.mrf.mxu2  ;;  %1229 = vmatmul.f32.gmra.mxu0 %v1943_v8 }
  0xe2   : > { %v536_v22 = vadd.f32 %v2142_v58, %v535_v53  ;;  %1379 = vmatmul.f32.gmra.mxu1 %v1943_v8 }
  0xe3   : > { %v733_v10 = vpop.f32.mrf.mxu3 }
  0xe4   : > { %v2249_v4 = vadd.f32 %v733_v10, %v536_v22 }
  0xe6   : > { %2639 = vst [vmem:[#allocation21_spill] sm:$0xff] %v2249_v4  ;;  %837 = vmatmul.f32.gmra.mxu2 %v1982_v27  ;;  %v2252_v3 = vpop.f32.mrf.mxu0  ;;  %v2642_v4 = vand.u32 4294901760, %v2006_v25 }
  0xe7   : > { %v2254_v12 = vpop.f32.mrf.mxu1 }
  0xe8   : > { %1029 = vmatmul.f32.gmra.mxu3 %v2640_v57 }
  0xe9   : > { %v543_v29 = vpop.f32.mrf.mxu2  ;;  %1233 = vmatmul.f32.gmra.mxu0 %v1967_v56 }
  0xea   : > { %v544_v32 = vadd.f32 %v2142_v58, %v543_v29  ;;  %1383 = vmatmul.f32.gmra.mxu1 %v1967_v56 }
  0xeb   : > { %v737_v8 = vpop.f32.mrf.mxu3 }
  0xec   : > { %v2261_v53 = vadd.f32 %v737_v8, %v544_v32 }
  0xee   : > { %2641 = vst [vmem:[#allocation22_spill] sm:$0xff] %v2261_v53  ;;  %842 = vmatmul.f32.gmra.mxu2 %v2006_v25  ;;  %v2264_v22 = vpop.f32.mrf.mxu0  ;;  %v2644_v53 = vand.u32 4294901760, %v2030_v61 }
  0xef   : > { %v2266_v10 = vpop.f32.mrf.mxu1 }
  0xf0   : > { %1035 = vmatmul.f32.gmra.mxu3 %v2642_v4 }
  0xf1   : > { %v551_v27 = vpop.f32.mrf.mxu2  ;;  %1237 = vmatmul.f32.gmra.mxu0 %v1991_v7 }
  0xf2   : > { %v552_v57 = vadd.f32 %v2142_v58, %v551_v27  ;;  %1387 = vmatmul.f32.gmra.mxu1 %v1991_v7 }
  0xf3   : > { %v741_v56 = vpop.f32.mrf.mxu3 }
  0xf4   : > { %v2273_v29 = vadd.f32 %v741_v56, %v552_v57 }
  0xf6   : > { %2643 = vst [vmem:[#allocation23_spill] sm:$0xff] %v2273_v29  ;;  %847 = vmatmul.f32.gmra.mxu2 %v2030_v61  ;;  %v2276_v32 = vpop.f32.mrf.mxu0  ;;  %v2646_v29 = vand.u32 4294901760, %v2054_v46 }
  0xf7   : > { %v2278_v8 = vpop.f32.mrf.mxu1 }
  0xf8   : > { %1041 = vmatmul.f32.gmra.mxu3 %v2644_v53 }
  0xf9   : > { %v559_v25 = vpop.f32.mrf.mxu2  ;;  %1241 = vmatmul.f32.gmra.mxu0 %v2015_v31 }
  0xfa   : > { %v560_v4 = vadd.f32 %v2142_v58, %v559_v25  ;;  %1391 = vmatmul.f32.gmra.mxu1 %v2015_v31 }
  0xfb   : > { %v745_v7 = vpop.f32.mrf.mxu3 }
  0xfc   : > { %v2285_v27 = vadd.f32 %v745_v7, %v560_v4 }
  0xfe   : > { %2645 = vst [vmem:[#allocation24_spill] sm:$0xff] %v2285_v27  ;;  %852 = vmatmul.f32.gmra.mxu2 %v2054_v46  ;;  %v2288_v57 = vpop.f32.mrf.mxu0  ;;  %v2648_v27 = vand.u32 4294901760, %v2078_v6 }
  0xff   : > { %v2290_v56 = vpop.f32.mrf.mxu1 }
 0x100   : > { %1047 = vmatmul.f32.gmra.mxu3 %v2646_v29 }
 0x101   : > { %v567_v61 = vpop.f32.mrf.mxu2  ;;  %1245 = vmatmul.f32.gmra.mxu0 %v2039_v17 }
 0x102   : > { %v568_v53 = vadd.f32 %v2142_v58, %v567_v61  ;;  %1395 = vmatmul.f32.gmra.mxu1 %v2039_v17 }
 0x103   : > { %v749_v31 = vpop.f32.mrf.mxu3 }
 0x104   : > { %v2297_v25 = vadd.f32 %v749_v31, %v568_v53 }
 0x106   : > { %2647 = vst [vmem:[#allocation25_spill] sm:$0xff] %v2297_v25  ;;  %857 = vmatmul.f32.gmra.mxu2 %v2078_v6  ;;  %v2300_v4 = vpop.f32.mrf.mxu0  ;;  %v2650_v25 = vand.u32 4294901760, %v2102_v59 }
 0x107   : > { %v2302_v7 = vpop.f32.mrf.mxu1 }
 0x108   : > { %1053 = vmatmul.f32.gmra.mxu3 %v2648_v27 }
 0x109   : > { %v575_v46 = vpop.f32.mrf.mxu2  ;;  %1249 = vmatmul.f32.gmra.mxu0 %v2063_v39 }
 0x10a   : > { %v576_v29 = vadd.f32 %v2142_v58, %v575_v46  ;;  %1399 = vmatmul.f32.gmra.mxu1 %v2063_v39 }
 0x10b   : > { %v753_v17 = vpop.f32.mrf.mxu3 }
 0x10c   : > { %v2309_v61 = vadd.f32 %v753_v17, %v576_v29 }
 0x10e   : > { %2649 = vst [vmem:[#allocation26_spill] sm:$0xff] %v2309_v61  ;;  %862 = vmatmul.f32.gmra.mxu2 %v2102_v59  ;;  %v2312_v53 = vpop.f32.mrf.mxu0  ;;  %v2653_v61 = vand.u32 4294901760, %v2123_v0 }
 0x10f   : > { %v2314_v31 = vpop.f32.mrf.mxu1 }
 0x110   : > { %1059 = vmatmul.f32.gmra.mxu3 %v2650_v25 }
 0x111   : > { %v583_v6 = vpop.f32.mrf.mxu2  ;;  %1253 = vmatmul.f32.gmra.mxu0 %v2087_v40 }
 0x112   : > { %v584_v27 = vadd.f32 %v2142_v58, %v583_v6  ;;  %1403 = vmatmul.f32.gmra.mxu1 %v2087_v40  ;;  %v344_v6 = vadd.f32 %v2142_v58, %v2144_v47  ;;  %v352_v47 = vadd.f32 %v2142_v58, %v2156_v5 }
 0x113   : > { %v757_v39 = vpop.f32.mrf.mxu3 }
 0x114   : > { %v2321_v46 = vadd.f32 %v757_v39, %v584_v27 }
 0x116   : > { %2651 = vst [vmem:[#allocation27_spill] sm:$0xff] %v2321_v46  ;;  %867 = vmatmul.f32.gmra.mxu2 %v2123_v0  ;;  %v2324_v29 = vpop.f32.mrf.mxu0  ;;  %v638_v0 = vadd.f32 %v2146_v14, %v344_v6 }
 0x117   : > { %v2326_v17 = vpop.f32.mrf.mxu1 }
 0x118   : > { %2652 = vst [vmem:[#allocation28_spill] sm:$0xff] %v2326_v17  ;;  %1065 = vmatmul.f32.gmra.mxu3 %v2653_v61  ;;  %v2655_v61 = vand.u32 4294901760, %v1744_v38 }
 0x119   : > { %v591_v59 = vpop.f32.mrf.mxu2  ;;  %1257 = vmatmul.f32.gmra.mxu0 %v2110_v15 }
 0x11a   : > { %v592_v25 = vadd.f32 %v2142_v58, %v591_v59  ;;  %1407 = vmatmul.f32.gmra.mxu1 %v2110_v15 }
 0x11b   : > { %v761_v40 = vpop.f32.mrf.mxu3 }
 0x11c   : > { %v2335_v27 = vadd.f32 %v761_v40, %v592_v25 }
 0x11e   : > { %2654 = vst [vmem:[#allocation29_spill] sm:$0xff] %v2335_v27  ;;  %872 = vmatmul.f32.gmra.mxu2 %v1744_v38  ;;  %v1198_v39 = vpop.f32.mrf.mxu0  ;;  %v642_v38 = vadd.f32 %v2158_v23, %v352_v47 }
 0x11f   : > { %v1348_v46 = vpop.f32.mrf.mxu1 }
 0x120   : > { %1071 = vmatmul.f32.gmra.mxu3 %v2655_v61  ;;  %v2656_v61 = vand.u32 4294901760, %v1750_v41 }
 0x121   : > { %v793_v17 = vpop.f32.mrf.mxu2  ;;  %1261 = vmatmul.f32.gmra.mxu0 %v1732_v30 }
 0x122   : > { %v794_v15 = vadd.f32 %v793_v17, %v638_v0  ;;  %1411 = vmatmul.f32.gmra.mxu1 %v1732_v30 }
 0x123   : > { %v976_v59 = vpop.f32.mrf.mxu3 }
 0x124   : > { %v977_v25 = vadd.f32 %v976_v59, %v794_v15 }
 0x126   : > { %v1199_v40 = vadd.f32 %v1198_v39, %v977_v25  ;;  %877 = vmatmul.f32.gmra.mxu2 %v1750_v41  ;;  %v1202_v27 = vpop.f32.mrf.mxu0  ;;  %v360_v41 = vadd.f32 %v2142_v58, %v2168_v54  ;;  %v2657_v25 = vand.u32 4294901760, %v1787_v62 }
 0x127   : > { %v1352_v14 = vpop.f32.mrf.mxu1 }
 0x128   : > { %v1349_v6 = vadd.f32 %v1348_v46, %v1199_v40  ;;  %1077 = vmatmul.f32.gmra.mxu3 %v2656_v61  ;;  %v646_v59 = vadd.f32 %v2170_v55, %v360_v41  ;;  %v376_v41 = vadd.f32 %v2142_v58, %v2192_v13 }
 0x129   : > { %v798_v30 = vpop.f32.mrf.mxu2  ;;  %1265 = vmatmul.f32.gmra.mxu0 %v1741_v36 }
 0x12a   : > { %v1475_v5 = vmax.f32 %v1349_v6, 0.0  ;;  %v799_v17 = vadd.f32 %v798_v30, %v642_v38  ;;  %1415 = vmatmul.f32.gmra.mxu1 %v1741_v36 }
 0x12b   : > { %v982_v23 = vpop.f32.mrf.mxu3 }
 0x12c   : > { %1508 = vst.msk [vmem:[%s2354_s6] sm:$0xff] %vm1507_vm2, %v1475_v5  ;;  %v983_v46 = vadd.f32 %v982_v23, %v799_v17  ;;  %v2658_v5 = vand.u32 4294901760, %v1822_v21 }
 0x12e   : > { %v1203_v39 = vadd.f32 %v1202_v27, %v983_v46  ;;  %882 = vmatmul.f32.gmra.mxu2 %v1787_v62  ;;  %v1206_v0 = vpop.f32.mrf.mxu0  ;;  %v368_v27 = vadd.f32 %v2142_v58, %v2180_v26 }
 0x12f   : > { %v1356_v15 = vpop.f32.mrf.mxu1 }
 0x130   : > { %v1353_v47 = vadd.f32 %v1352_v14, %v1203_v39  ;;  %1083 = vmatmul.f32.gmra.mxu3 %v2657_v25  ;;  %v650_v61 = vadd.f32 %v2182_v42, %v368_v27 }
 0x131   : > { %v803_v36 = vpop.f32.mrf.mxu2  ;;  %1269 = vmatmul.f32.gmra.mxu0 %v1770_v52 }
 0x132   : > { %v1476_v40 = vmax.f32 %v1353_v47, 0.0  ;;  %v804_v54 = vadd.f32 %v803_v36, %v646_v59  ;;  %1419 = vmatmul.f32.gmra.mxu1 %v1770_v52  ;;  %v2659_v59 = vand.u32 4294901760, %v1853_v28  ;;  %v384_v36 = vadd.f32 %v2142_v58, %v2204_v33 }
 0x133   : > { %v988_v38 = vpop.f32.mrf.mxu3 }
 0x134   : > { %1509 = vst.msk [vmem:[%s2354_s6 + $0x8] sm:$0xff] %vm1507_vm2, %v1476_v40  ;;  %v989_v6 = vadd.f32 %v988_v38, %v804_v54  ;;  %v658_v38 = vadd.f32 %v2206_v60, %v384_v36 }
 0x136   : > { %v1207_v55 = vadd.f32 %v1206_v0, %v989_v6  ;;  %887 = vmatmul.f32.gmra.mxu2 %v1822_v21  ;;  %v1210_v62 = vpop.f32.mrf.mxu0  ;;  %v654_v0 = vadd.f32 %v2194_v44, %v376_v41  ;;  %v2660_v6 = vand.u32 4294901760, %v1877_v50  ;;  %v400_v41 = vadd.f32 %v2142_v58, %v2228_v48 }
 0x137   : > { %v1360_v14 = vpop.f32.mrf.mxu1 }
 0x138   : > { %v1357_v30 = vadd.f32 %v1356_v15, %v1207_v55  ;;  %1089 = vmatmul.f32.gmra.mxu3 %v2658_v5 }
 0x139   : > { %v808_v52 = vpop.f32.mrf.mxu2  ;;  %1273 = vmatmul.f32.gmra.mxu0 %v1803_v11 }
 0x13a   : > { %v1477_v17 = vmax.f32 %v1357_v30, 0.0  ;;  %v809_v26 = vadd.f32 %v808_v52, %v650_v61  ;;  %1423 = vmatmul.f32.gmra.mxu1 %v1803_v11 }
 0x13b   : > { %v994_v23 = vpop.f32.mrf.mxu3 }
 0x13c   : > { %1510 = vst.msk [vmem:[%s2354_s6 + $0x10] sm:$0xff] %vm1507_vm2, %v1477_v17  ;;  %v995_v46 = vadd.f32 %v994_v23, %v809_v26  ;;  %v2661_v17 = vand.u32 4294901760, %v1901_v16 }
 0x13e   : > { %v1211_v42 = vadd.f32 %v1210_v62, %v995_v46  ;;  %892 = vmatmul.f32.gmra.mxu2 %v1853_v28  ;;  %v1214_v21 = vpop.f32.mrf.mxu0 }
 0x13f   : > { %v1364_v39 = vpop.f32.mrf.mxu1 }
 0x140   : > { %v1361_v15 = vadd.f32 %v1360_v14, %v1211_v42  ;;  %1095 = vmatmul.f32.gmra.mxu3 %v2659_v59  ;;  %v392_v14 = vadd.f32 %v2142_v58, %v2216_v34 }
 0x141   : > { %v813_v11 = vpop.f32.mrf.mxu2  ;;  %1277 = vmatmul.f32.gmra.mxu0 %v1840_v20 }
 0x142   : > { %v1478_v47 = vmax.f32 %v1361_v15, 0.0  ;;  %v814_v13 = vadd.f32 %v813_v11, %v654_v0  ;;  %1427 = vmatmul.f32.gmra.mxu1 %v1840_v20  ;;  %v662_v5 = vadd.f32 %v2218_v18, %v392_v14  ;;  %v2662_v0 = vand.u32 4294901760, %v1925_v37 }
 0x143   : > { %v1000_v25 = vpop.f32.mrf.mxu3  ;;  %v408_v11 = vadd.f32 %v2142_v58, %v2240_v49 }
 0x144   : > { %1511 = vst.msk [vmem:[%s2354_s6 + $0x18] sm:$0xff] %vm1507_vm2, %v1478_v47  ;;  %v1001_v40 = vadd.f32 %v1000_v25, %v814_v13 }
 0x145   : > { %v670_v25 = vadd.f32 %v2242_v45, %v408_v11 }
 0x146   : > { %v1215_v44 = vadd.f32 %v1214_v21, %v1001_v40  ;;  %897 = vmatmul.f32.gmra.mxu2 %v1877_v50  ;;  %v1218_v28 = vpop.f32.mrf.mxu0  ;;  %v666_v21 = vadd.f32 %v2230_v9, %v400_v41  ;;  %v2663_v40 = vand.u32 4294901760, %v1949_v19 }
 0x147   : > { %v1368_v54 = vpop.f32.mrf.mxu1 }
 0x148   : > { %v1365_v27 = vadd.f32 %v1364_v39, %v1215_v44  ;;  %1101 = vmatmul.f32.gmra.mxu3 %v2660_v6  ;;  %v2664_v44 = vld [vmem:[#allocation2_spill] sm:$0xff]  ;;  %v2665_v6 = vld [vmem:[#allocation4_spill] sm:$0xff] }
 0x149   : > { %v818_v20 = vpop.f32.mrf.mxu2  ;;  %1281 = vmatmul.f32.gmra.mxu0 %v1866_v35 }
 0x14a   : > { %v1479_v55 = vmax.f32 %v1365_v27, 0.0  ;;  %v819_v33 = vadd.f32 %v818_v20, %v658_v38  ;;  %1431 = vmatmul.f32.gmra.mxu1 %v1866_v35  ;;  %v416_v38 = vadd.f32 %v2142_v58, %v2252_v3 }
 0x14b   : > { %v1006_v62 = vpop.f32.mrf.mxu3 }
 0x14c   : > { %1512 = vst.msk [vmem:[%s2354_s6 + $0x20] sm:$0xff] %vm1507_vm2, %v1479_v55  ;;  %v1007_v61 = vadd.f32 %v1006_v62, %v819_v33  ;;  %v674_v55 = vadd.f32 %v2254_v12, %v416_v38  ;;  %v2666_v62 = vand.u32 4294901760, %v2665_v6  ;;  %v2676_v38 = vld [vmem:[#allocation9_spill] sm:$0xff] }
 0x14e   : > { %v1219_v60 = vadd.f32 %v1218_v28, %v1007_v61  ;;  %902 = vmatmul.f32.gmra.mxu2 %v1901_v16  ;;  %v1222_v50 = vpop.f32.mrf.mxu0  ;;  %v2667_v61 = vld [vmem:[#allocation3_spill] sm:$0xff] }
 0x14f   : > { %v1372_v30 = vpop.f32.mrf.mxu1 }
 0x150   : > { %v1369_v52 = vadd.f32 %v1368_v54, %v1219_v60  ;;  %1107 = vmatmul.f32.gmra.mxu3 %v2661_v17 }
 0x151   : > { %v823_v35 = vpop.f32.mrf.mxu2  ;;  %1285 = vmatmul.f32.gmra.mxu0 %v1890_v63 }
 0x152   : > { %v1480_v26 = vmax.f32 %v1369_v52, 0.0  ;;  %v824_v34 = vadd.f32 %v823_v35, %v662_v5  ;;  %1435 = vmatmul.f32.gmra.mxu1 %v1890_v63  ;;  %v2668_v52 = vld [vmem:[#allocation6_spill] sm:$0xff] }
 0x153   : > { %v1012_v23 = vpop.f32.mrf.mxu3 }
 0x154   : > { %1513 = vst.msk [vmem:[%s2354_s6 + $0x28] sm:$0xff] %vm1507_vm2, %v1480_v26  ;;  %v1013_v46 = vadd.f32 %v1012_v23, %v824_v34  ;;  %v2669_v23 = vand.u32 4294901760, %v2668_v52 }
 0x156   : > { %v1223_v18 = vadd.f32 %v1222_v50, %v1013_v46  ;;  %907 = vmatmul.f32.gmra.mxu2 %v1925_v37  ;;  %v1226_v16 = vpop.f32.mrf.mxu0  ;;  %v2670_v46 = vld [vmem:[#allocation5_spill] sm:$0xff] }
 0x157   : > { %v1376_v42 = vpop.f32.mrf.mxu1 }
 0x158   : > { %v1373_v39 = vadd.f32 %v1372_v30, %v1223_v18  ;;  %1113 = vmatmul.f32.gmra.mxu3 %v2662_v0  ;;  %v424_v30 = vadd.f32 %v2142_v58, %v2264_v22 }
 0x159   : > { %v828_v63 = vpop.f32.mrf.mxu2  ;;  %1289 = vmatmul.f32.gmra.mxu0 %v1914_v24 }
 0x15a   : > { %v1481_v15 = vmax.f32 %v1373_v39, 0.0  ;;  %v829_v48 = vadd.f32 %v828_v63, %v666_v21  ;;  %1439 = vmatmul.f32.gmra.mxu1 %v1914_v24  ;;  %v678_v26 = vadd.f32 %v2266_v10, %v424_v30  ;;  %v2671_v39 = vld [vmem:[#allocation8_spill] sm:$0xff]  ;;  %v456_v30 = vadd.f32 %v2142_v58, %v2312_v53 }
 0x15b   : > { %v1018_v59 = vpop.f32.mrf.mxu3 }
 0x15c   : > { %1514 = vst.msk [vmem:[%s2354_s6 + $0x30] sm:$0xff] %vm1507_vm2, %v1481_v15  ;;  %v1019_v47 = vadd.f32 %v1018_v59, %v829_v48  ;;  %v2672_v59 = vand.u32 4294901760, %v2671_v39 }
 0x15e   : > { %v1227_v9 = vadd.f32 %v1226_v16, %v1019_v47  ;;  %912 = vmatmul.f32.gmra.mxu2 %v1949_v19  ;;  %v1230_v37 = vpop.f32.mrf.mxu0  ;;  %v2673_v47 = vld [vmem:[#allocation7_spill] sm:$0xff] }
 0x15f   : > { %v1380_v13 = vpop.f32.mrf.mxu1 }
 0x160   : > { %v1377_v36 = vadd.f32 %v1376_v42, %v1227_v9  ;;  %1119 = vmatmul.f32.gmra.mxu3 %v2663_v40  ;;  %v432_v42 = vadd.f32 %v2142_v58, %v2276_v32 }
 0x161   : > { %v833_v24 = vpop.f32.mrf.mxu2  ;;  %1293 = vmatmul.f32.gmra.mxu0 %v2664_v44 }
 0x162   : > { %v1482_v28 = vmax.f32 %v1377_v36, 0.0  ;;  %v834_v49 = vadd.f32 %v833_v24, %v670_v25  ;;  %1443 = vmatmul.f32.gmra.mxu1 %v2664_v44  ;;  %v682_v15 = vadd.f32 %v2278_v8, %v432_v42  ;;  %v2674_v36 = vld [vmem:[#allocation10_spill] sm:$0xff] }
 0x163   : > { %v1024_v54 = vpop.f32.mrf.mxu3 }
 0x164   : > { %1515 = vst.msk [vmem:[%s2354_s6 + $0x38] sm:$0xff] %vm1507_vm2, %v1482_v28  ;;  %v1025_v27 = vadd.f32 %v1024_v54, %v834_v49  ;;  %v2675_v49 = vand.u32 4294901760, %v2674_v36 }
 0x166   : > { %v1231_v45 = vadd.f32 %v1230_v37, %v1025_v27  ;;  %917 = vmatmul.f32.gmra.mxu2 %v2665_v6  ;;  %v1234_v19 = vpop.f32.mrf.mxu0  ;;  %v448_v6 = vadd.f32 %v2142_v58, %v2300_v4 }
 0x167   : > { %v1384_v20 = vpop.f32.mrf.mxu1 }
 0x168   : > { %v1381_v33 = vadd.f32 %v1380_v13, %v1231_v45  ;;  %1125 = vmatmul.f32.gmra.mxu3 %v2666_v62  ;;  %v440_v13 = vadd.f32 %v2142_v58, %v2288_v57  ;;  %v690_v62 = vadd.f32 %v2302_v7, %v448_v6 }
 0x169   : > { %v838_v14 = vpop.f32.mrf.mxu2  ;;  %1297 = vmatmul.f32.gmra.mxu0 %v2667_v61 }
 0x16a   : > { %v1483_v60 = vmax.f32 %v1381_v33, 0.0  ;;  %v839_v3 = vadd.f32 %v838_v14, %v674_v55  ;;  %1447 = vmatmul.f32.gmra.mxu1 %v2667_v61  ;;  %v686_v44 = vadd.f32 %v2290_v56, %v440_v13 }
 0x16b   : > { %v1030_v50 = vpop.f32.mrf.mxu3 }
 0x16c   : > { %1516 = vst.msk [vmem:[%s2354_s6 + $0x40] sm:$0xff] %vm1507_vm2, %v1483_v60  ;;  %v1031_v5 = vadd.f32 %v1030_v50, %v839_v3 }
 0x16e   : > { %v1235_v12 = vadd.f32 %v1234_v19, %v1031_v5  ;;  %922 = vmatmul.f32.gmra.mxu2 %v2668_v52  ;;  %v1238_v17 = vpop.f32.mrf.mxu0 }
 0x16f   : > { %v1388_v35 = vpop.f32.mrf.mxu1 }
 0x170   : > { %v1385_v34 = vadd.f32 %v1384_v20, %v1235_v12  ;;  %1131 = vmatmul.f32.gmra.mxu3 %v2669_v23  ;;  %v2677_v20 = vld [vmem:[#allocation11_spill] sm:$0xff] }
 0x171   : > { %v843_v41 = vpop.f32.mrf.mxu2  ;;  %1301 = vmatmul.f32.gmra.mxu0 %v2670_v46  ;;  %v2678_v61 = vand.u32 4294901760, %v2677_v20 }
 0x172   : > { %v1484_v18 = vmax.f32 %v1385_v34, 0.0  ;;  %v844_v22 = vadd.f32 %v843_v41, %v678_v26  ;;  %1451 = vmatmul.f32.gmra.mxu1 %v2670_v46  ;;  %v2679_v26 = vand.u32 4294901760, %v2093_v2  ;;  %v464_v41 = vadd.f32 %v2142_v58, %v2324_v29 }
 0x173   : > { %v1036_v16 = vpop.f32.mrf.mxu3 }
 0x174   : > { %1517 = vst.msk [vmem:[%s2354_s6 + $0x48] sm:$0xff] %vm1507_vm2, %v1484_v18  ;;  %v1037_v21 = vadd.f32 %v1036_v16, %v844_v22  ;;  %v2680_v22 = vld [vmem:[#allocation28_spill] sm:$0xff] }
 0x175   : > { %v698_v16 = vadd.f32 %v2680_v22, %v464_v41 }
 0x176   : > { %v1239_v10 = vadd.f32 %v1238_v17, %v1037_v21  ;;  %927 = vmatmul.f32.gmra.mxu2 %v2671_v39  ;;  %v1242_v0 = vpop.f32.mrf.mxu0  ;;  %v694_v17 = vadd.f32 %v2314_v31, %v456_v30  ;;  %v2681_v21 = vand.u32 4294901760, %v2116_v43 }
 0x177   : > { %v1392_v63 = vpop.f32.mrf.mxu1 }
 0x178   : > { %v1389_v48 = vadd.f32 %v1388_v35, %v1239_v10  ;;  %1137 = vmatmul.f32.gmra.mxu3 %v2672_v59  ;;  %v2682_v10 = vld [vmem:[#allocation12_spill] sm:$0xff] }
 0x179   : > { %v848_v11 = vpop.f32.mrf.mxu2  ;;  %1305 = vmatmul.f32.gmra.mxu0 %v2673_v47 }
 0x17a   : > { %v1485_v9 = vmax.f32 %v1389_v48, 0.0  ;;  %v849_v32 = vadd.f32 %v848_v11, %v682_v15  ;;  %1455 = vmatmul.f32.gmra.mxu1 %v2673_v47  ;;  %v2683_v47 = vld [vmem:[#allocation13_spill] sm:$0xff] }
 0x17b   : > { %v1042_v37 = vpop.f32.mrf.mxu3 }
 0x17c   : > { %1518 = vst.msk [vmem:[%s2354_s6 + $0x50] sm:$0xff] %vm1507_vm2, %v1485_v9  ;;  %v1043_v25 = vadd.f32 %v1042_v37, %v849_v32 }
 0x17e   : > { %v1243_v8 = vadd.f32 %v1242_v0, %v1043_v25  ;;  %932 = vmatmul.f32.gmra.mxu2 %v2674_v36  ;;  %v1246_v40 = vpop.f32.mrf.mxu0 }
 0x17f   : > { %v1396_v24 = vpop.f32.mrf.mxu1 }
 0x180   : > { %v1393_v28 = vadd.f32 %v1392_v63, %v1243_v8  ;;  %1143 = vmatmul.f32.gmra.mxu3 %v2675_v49 }
 0x181   : > { %v853_v54 = vpop.f32.mrf.mxu2  ;;  %1309 = vmatmul.f32.gmra.mxu0 %v2676_v38 }
 0x182   : > { %v1486_v27 = vmax.f32 %v1393_v28, 0.0  ;;  %v854_v57 = vadd.f32 %v853_v54, %v686_v44  ;;  %1459 = vmatmul.f32.gmra.mxu1 %v2676_v38  ;;  %v2684_v44 = vld [vmem:[#allocation14_spill] sm:$0xff] }
 0x183   : > { %v1048_v45 = vpop.f32.mrf.mxu3 }
 0x184   : > { %1519 = vst.msk [vmem:[%s2354_s6 + $0x58] sm:$0xff] %vm1507_vm2, %v1486_v27  ;;  %v1049_v19 = vadd.f32 %v1048_v45, %v854_v57 }
 0x186   : > { %v1247_v56 = vadd.f32 %v1246_v40, %v1049_v19  ;;  %937 = vmatmul.f32.gmra.mxu2 %v2677_v20  ;;  %v1250_v55 = vpop.f32.mrf.mxu0 }
 0x187   : > { %v1400_v33 = vpop.f32.mrf.mxu1 }
 0x188   : > { %v1397_v14 = vadd.f32 %v1396_v24, %v1247_v56  ;;  %1149 = vmatmul.f32.gmra.mxu3 %v2678_v61  ;;  %v2685_v56 = vld [vmem:[#allocation15_spill] sm:$0xff] }
 0x189   : > { %v858_v60 = vpop.f32.mrf.mxu2  ;;  %1313 = vmatmul.f32.gmra.mxu0 %v2058_v51 }
 0x18a   : > { %v1487_v3 = vmax.f32 %v1397_v14, 0.0  ;;  %v859_v4 = vadd.f32 %v858_v60, %v690_v62  ;;  %1463 = vmatmul.f32.gmra.mxu1 %v2058_v51 }
 0x18b   : > { %v1054_v50 = vpop.f32.mrf.mxu3 }
 0x18c   : > { %1520 = vst.msk [vmem:[%s2354_s6 + $0x60] sm:$0xff] %vm1507_vm2, %v1487_v3  ;;  %v1055_v5 = vadd.f32 %v1054_v50, %v859_v4  ;;  %v2686_v50 = vld [vmem:[#allocation16_spill] sm:$0xff] }
 0x18e   : > { %v1251_v7 = vadd.f32 %v1250_v55, %v1055_v5  ;;  %942 = vmatmul.f32.gmra.mxu2 %v2093_v2  ;;  %v1254_v12 = vpop.f32.mrf.mxu0 }
 0x18f   : > { %v1404_v52 = vpop.f32.mrf.mxu1 }
 0x190   : > { %v1401_v35 = vadd.f32 %v1400_v33, %v1251_v7  ;;  %1155 = vmatmul.f32.gmra.mxu3 %v2679_v26 }
 0x191   : > { %v863_v51 = vpop.f32.mrf.mxu2  ;;  %1317 = vmatmul.f32.gmra.mxu0 %v2082_v1 }
 0x192   : > { %v1488_v34 = vmax.f32 %v1401_v35, 0.0  ;;  %v864_v53 = vadd.f32 %v863_v51, %v694_v17  ;;  %1467 = vmatmul.f32.gmra.mxu1 %v2082_v1 }
 0x193   : > { %v1060_v23 = vpop.f32.mrf.mxu3 }
 0x194   : > { %1521 = vst.msk [vmem:[%s2354_s6 + $0x68] sm:$0xff] %vm1507_vm2, %v1488_v34  ;;  %v1061_v46 = vadd.f32 %v1060_v23, %v864_v53  ;;  %v2687_v34 = vld [vmem:[#allocation17_spill] sm:$0xff] }
 0x196   : > { %v1255_v31 = vadd.f32 %v1254_v12, %v1061_v46  ;;  %947 = vmatmul.f32.gmra.mxu2 %v2116_v43  ;;  %v1258_v2 = vpop.f32.mrf.mxu0 }
 0x197   : > { %v1408_v18 = vpop.f32.mrf.mxu1 }
 0x198   : > { %v1405_v42 = vadd.f32 %v1404_v52, %v1255_v31  ;;  %1161 = vmatmul.f32.gmra.mxu3 %v2681_v21 }
 0x199   : > { %v868_v1 = vpop.f32.mrf.mxu2  ;;  %1321 = vmatmul.f32.gmra.mxu0 %v2682_v10 }
 0x19a   : > { %v1489_v58 = vmax.f32 %v1405_v42, 0.0  ;;  %v869_v29 = vadd.f32 %v868_v1, %v698_v16  ;;  %1471 = vmatmul.f32.gmra.mxu1 %v2682_v10  ;;  %v2688_v42 = vld [vmem:[#allocation18_spill] sm:$0xff] }
 0x19b   : > { %v1066_v39 = vpop.f32.mrf.mxu3 }
 0x19c   : > { %1522 = vst.msk [vmem:[%s2354_s6 + $0x70] sm:$0xff] %vm1507_vm2, %v1489_v58  ;;  %v1067_v0 = vadd.f32 %v1066_v39, %v869_v29 }
 0x19e   : > { %v1259_v63 = vadd.f32 %v1258_v2, %v1067_v0  ;;  %v1262_v15 = vpop.f32.mrf.mxu0 }
 0x19f   : > { %v1412_v48 = vpop.f32.mrf.mxu1 }
 0x1a0   : > { %v1409_v59 = vadd.f32 %v1408_v18, %v1259_v63 }
 0x1a1   : > { %v873_v11 = vpop.f32.mrf.mxu2 }
 0x1a2   : > { %v1490_v43 = vmax.f32 %v1409_v59, 0.0  ;;  %v874_v9 = vadd.f32 %v873_v11, %v2683_v47 }
 0x1a3   : > { %v1072_v32 = vpop.f32.mrf.mxu3 }
 0x1a4   : > { %1523 = vst.msk [vmem:[%s2354_s6 + $0x78] sm:$0xff] %vm1507_vm2, %v1490_v43  ;;  %v1073_v37 = vadd.f32 %v1072_v32, %v874_v9 }
 0x1a6   : > { %v1263_v13 = vadd.f32 %v1262_v15, %v1073_v37  ;;  %v1266_v25 = vpop.f32.mrf.mxu0 }
 0x1a7   : > { %v1416_v8 = vpop.f32.mrf.mxu1 }
 0x1a8   : > { %v1413_v36 = vadd.f32 %v1412_v48, %v1263_v13  ;;  %v2689_v48 = vld [vmem:[#allocation19_spill] sm:$0xff] }
 0x1a9   : > { %v878_v40 = vpop.f32.mrf.mxu2 }
 0x1aa   : > { %v1491_v24 = vmax.f32 %v1413_v36, 0.0  ;;  %v879_v28 = vadd.f32 %v878_v40, %v2684_v44 }
 0x1ab   : > { %v1078_v49 = vpop.f32.mrf.mxu3 }
 0x1ac   : > { %1524 = vst.msk [vmem:[%s2354_s6 + $0x80] sm:$0xff] %vm1507_vm2, %v1491_v24  ;;  %v1079_v54 = vadd.f32 %v1078_v49, %v879_v28 }
 0x1ae   : > { %v1267_v38 = vadd.f32 %v1266_v25, %v1079_v54  ;;  %v1270_v27 = vpop.f32.mrf.mxu0 }
 0x1af   : > { %v1420_v57 = vpop.f32.mrf.mxu1 }
 0x1b0   : > { %v1417_v45 = vadd.f32 %v1416_v8, %v1267_v38  ;;  %v2690_v8 = vld [vmem:[#allocation20_spill] sm:$0xff] }
 0x1b1   : > { %v883_v6 = vpop.f32.mrf.mxu2 }
 0x1b2   : > { %v1492_v19 = vmax.f32 %v1417_v45, 0.0  ;;  %v884_v20 = vadd.f32 %v883_v6, %v2685_v56 }
 0x1b3   : > { %v1084_v55 = vpop.f32.mrf.mxu3 }
 0x1b4   : > { %1525 = vst.msk [vmem:[%s2354_s6 + $0x88] sm:$0xff] %vm1507_vm2, %v1492_v19  ;;  %v1085_v33 = vadd.f32 %v1084_v55, %v884_v20 }
 0x1b6   : > { %v1271_v62 = vadd.f32 %v1270_v27, %v1085_v33  ;;  %v1274_v14 = vpop.f32.mrf.mxu0 }
 0x1b7   : > { %v1424_v61 = vpop.f32.mrf.mxu1 }
 0x1b8   : > { %v1421_v60 = vadd.f32 %v1420_v57, %v1271_v62  ;;  %v2691_v57 = vld [vmem:[#allocation21_spill] sm:$0xff] }
 0x1b9   : > { %v888_v3 = vpop.f32.mrf.mxu2 }
 0x1ba   : > { %v1493_v4 = vmax.f32 %v1421_v60, 0.0  ;;  %v889_v30 = vadd.f32 %v888_v3, %v2686_v50 }
 0x1bb   : > { %v1090_v5 = vpop.f32.mrf.mxu3 }
 0x1bc   : > { %1526 = vst.msk [vmem:[%s2354_s6 + $0x90] sm:$0xff] %vm1507_vm2, %v1493_v4  ;;  %v1091_v7 = vadd.f32 %v1090_v5, %v889_v30 }
 0x1be   : > { %v1275_v12 = vadd.f32 %v1274_v14, %v1091_v7  ;;  %v1278_v52 = vpop.f32.mrf.mxu0 }
 0x1bf   : > { %v1428_v17 = vpop.f32.mrf.mxu1 }
 0x1c0   : > { %v1425_v35 = vadd.f32 %v1424_v61, %v1275_v12  ;;  %v2692_v61 = vld [vmem:[#allocation22_spill] sm:$0xff] }
 0x1c1   : > { %v893_v26 = vpop.f32.mrf.mxu2 }
 0x1c2   : > { %v1494_v51 = vmax.f32 %v1425_v35, 0.0  ;;  %v894_v53 = vadd.f32 %v893_v26, %v2687_v34 }
 0x1c3   : > { %v1096_v23 = vpop.f32.mrf.mxu3 }
 0x1c4   : > { %1527 = vst.msk [vmem:[%s2354_s6 + $0x98] sm:$0xff] %vm1507_vm2, %v1494_v51  ;;  %v1097_v41 = vadd.f32 %v1096_v23, %v894_v53 }
 0x1c6   : > { %v1279_v46 = vadd.f32 %v1278_v52, %v1097_v41  ;;  %v1282_v31 = vpop.f32.mrf.mxu0 }
 0x1c7   : > { %v1432_v2 = vpop.f32.mrf.mxu1 }
 0x1c8   : > { %v1429_v18 = vadd.f32 %v1428_v17, %v1279_v46  ;;  %v2693_v17 = vld [vmem:[#allocation23_spill] sm:$0xff] }
 0x1c9   : > { %v898_v22 = vpop.f32.mrf.mxu2 }
 0x1ca   : > { %v1495_v16 = vmax.f32 %v1429_v18, 0.0  ;;  %v899_v21 = vadd.f32 %v898_v22, %v2688_v42 }
 0x1cb   : > { %v1102_v1 = vpop.f32.mrf.mxu3 }
 0x1cc   : > { %1528 = vst.msk [vmem:[%s2354_s6 + $0xa0] sm:$0xff] %vm1507_vm2, %v1495_v16  ;;  %v1103_v10 = vadd.f32 %v1102_v1, %v899_v21 }
 0x1ce   : > { %v1283_v58 = vadd.f32 %v1282_v31, %v1103_v10  ;;  %v1286_v29 = vpop.f32.mrf.mxu0 }
 0x1cf   : > { %v1436_v39 = vpop.f32.mrf.mxu1 }
 0x1d0   : > { %v1433_v0 = vadd.f32 %v1432_v2, %v1283_v58  ;;  %v2694_v2 = vld [vmem:[#allocation24_spill] sm:$0xff] }
 0x1d1   : > { %v903_v63 = vpop.f32.mrf.mxu2 }
 0x1d2   : > { %v1496_v15 = vmax.f32 %v1433_v0, 0.0  ;;  %v904_v59 = vadd.f32 %v903_v63, %v2689_v48 }
 0x1d3   : > { %v1108_v11 = vpop.f32.mrf.mxu3 }
 0x1d4   : > { %1529 = vst.msk [vmem:[%s2354_s6 + $0xa8] sm:$0xff] %vm1507_vm2, %v1496_v15  ;;  %v1109_v43 = vadd.f32 %v1108_v11, %v904_v59 }
 0x1d6   : > { %v1287_v47 = vadd.f32 %v1286_v29, %v1109_v43  ;;  %v1290_v9 = vpop.f32.mrf.mxu0 }
 0x1d7   : > { %v1440_v32 = vpop.f32.mrf.mxu1 }
 0x1d8   : > { %v1437_v37 = vadd.f32 %v1436_v39, %v1287_v47  ;;  %v2695_v39 = vld [vmem:[#allocation25_spill] sm:$0xff] }
 0x1d9   : > { %v908_v13 = vpop.f32.mrf.mxu2 }
 0x1da   : > { %v1497_v25 = vmax.f32 %v1437_v37, 0.0  ;;  %v909_v36 = vadd.f32 %v908_v13, %v2690_v8 }
 0x1db   : > { %v1114_v40 = vpop.f32.mrf.mxu3 }
 0x1dc   : > { %1530 = vst.msk [vmem:[%s2354_s6 + $0xb0] sm:$0xff] %vm1507_vm2, %v1497_v25  ;;  %v1115_v24 = vadd.f32 %v1114_v40, %v909_v36 }
 0x1de   : > { %v1291_v44 = vadd.f32 %v1290_v9, %v1115_v24  ;;  %v1294_v28 = vpop.f32.mrf.mxu0 }
 0x1df   : > { %v1444_v49 = vpop.f32.mrf.mxu1 }
 0x1e0   : > { %v1441_v54 = vadd.f32 %v1440_v32, %v1291_v44  ;;  %v2696_v32 = vld [vmem:[#allocation26_spill] sm:$0xff] }
 0x1e1   : > { %v913_v38 = vpop.f32.mrf.mxu2 }
 0x1e2   : > { %v1498_v27 = vmax.f32 %v1441_v54, 0.0  ;;  %v914_v45 = vadd.f32 %v913_v38, %v2691_v57 }
 0x1e3   : > { %v1120_v6 = vpop.f32.mrf.mxu3 }
 0x1e4   : > { %1531 = vst.msk [vmem:[%s2354_s6 + $0xb8] sm:$0xff] %vm1507_vm2, %v1498_v27  ;;  %v1121_v19 = vadd.f32 %v1120_v6, %v914_v45 }
 0x1e6   : > { %v1295_v56 = vadd.f32 %v1294_v28, %v1121_v19  ;;  %v1298_v20 = vpop.f32.mrf.mxu0  ;;  %v2697_v28 = vld [vmem:[#allocation27_spill] sm:$0xff] }
 0x1e7   : > { %v1448_v55 = vpop.f32.mrf.mxu1 }
 0x1e8   : > { %v1445_v33 = vadd.f32 %v1444_v49, %v1295_v56  ;;  %v2698_v56 = vld [vmem:[#allocation29_spill] sm:$0xff] }
 0x1e9   : > { %v918_v62 = vpop.f32.mrf.mxu2 }
 0x1ea   : > { %v1499_v14 = vmax.f32 %v1445_v33, 0.0  ;;  %v919_v60 = vadd.f32 %v918_v62, %v2692_v61 }
 0x1eb   : > { %v1126_v3 = vpop.f32.mrf.mxu3 }
 0x1ec   : > { %1532 = vst.msk [vmem:[%s2354_s6 + $0xc0] sm:$0xff] %vm1507_vm2, %v1499_v14  ;;  %v1127_v4 = vadd.f32 %v1126_v3, %v919_v60 }
 0x1ee   : > { %v1299_v50 = vadd.f32 %v1298_v20, %v1127_v4  ;;  %v1302_v30 = vpop.f32.mrf.mxu0 }
 0x1ef   : > { %v1452_v5 = vpop.f32.mrf.mxu1 }
 0x1f0   : > { %v1449_v7 = vadd.f32 %v1448_v55, %v1299_v50 }
 0x1f1   : > { %v923_v12 = vpop.f32.mrf.mxu2 }
 0x1f2   : > { %v1500_v52 = vmax.f32 %v1449_v7, 0.0  ;;  %v924_v35 = vadd.f32 %v923_v12, %v2693_v17 }
 0x1f3   : > { %v1132_v26 = vpop.f32.mrf.mxu3 }
 0x1f4   : > { %1533 = vst.msk [vmem:[%s2354_s6 + $0xc8] sm:$0xff] %vm1507_vm2, %v1500_v52  ;;  %v1133_v51 = vadd.f32 %v1132_v26, %v924_v35 }
 0x1f6   : > { %v1303_v34 = vadd.f32 %v1302_v30, %v1133_v51  ;;  %v1306_v53 = vpop.f32.mrf.mxu0 }
 0x1f7   : > { %v1456_v23 = vpop.f32.mrf.mxu1 }
 0x1f8   : > { %v1453_v41 = vadd.f32 %v1452_v5, %v1303_v34 }
 0x1f9   : > { %v928_v46 = vpop.f32.mrf.mxu2 }
 0x1fa   : > { %v1501_v31 = vmax.f32 %v1453_v41, 0.0  ;;  %v929_v18 = vadd.f32 %v928_v46, %v2694_v2 }
 0x1fb   : > { %v1138_v22 = vpop.f32.mrf.mxu3 }
 0x1fc   : > { %1534 = vst.msk [vmem:[%s2354_s6 + $0xd0] sm:$0xff] %vm1507_vm2, %v1501_v31  ;;  %v1139_v16 = vadd.f32 %v1138_v22, %v929_v18 }
 0x1fe   : > { %v1307_v42 = vadd.f32 %v1306_v53, %v1139_v16  ;;  %v1310_v21 = vpop.f32.mrf.mxu0 }
 0x1ff   : > { %v1460_v1 = vpop.f32.mrf.mxu1 }
 0x200   : > { %v1457_v10 = vadd.f32 %v1456_v23, %v1307_v42 }
 0x201   : > { %v933_v58 = vpop.f32.mrf.mxu2 }
 0x202   : > { %v1502_v29 = vmax.f32 %v1457_v10, 0.0  ;;  %v934_v0 = vadd.f32 %v933_v58, %v2695_v39 }
 0x203   : > { %v1144_v63 = vpop.f32.mrf.mxu3 }
 0x204   : > { %1535 = vst.msk [vmem:[%s2354_s6 + $0xd8] sm:$0xff] %vm1507_vm2, %v1502_v29  ;;  %v1145_v15 = vadd.f32 %v1144_v63, %v934_v0 }
 0x206   : > { %v1311_v48 = vadd.f32 %v1310_v21, %v1145_v15  ;;  %v1314_v59 = vpop.f32.mrf.mxu0 }
 0x207   : > { %v1464_v47 = vpop.f32.mrf.mxu1 }
 0x208   : > { %v1461_v11 = vadd.f32 %v1460_v1, %v1311_v48 }
 0x209   : > { %v938_v43 = vpop.f32.mrf.mxu2 }
 0x20a   : > { %v1503_v9 = vmax.f32 %v1461_v11, 0.0  ;;  %v939_v37 = vadd.f32 %v938_v43, %v2696_v32 }
 0x20b   : > { %v1150_v13 = vpop.f32.mrf.mxu3 }
 0x20c   : > { %1536 = vst.msk [vmem:[%s2354_s6 + $0xe0] sm:$0xff] %vm1507_vm2, %v1503_v9  ;;  %v1151_v25 = vadd.f32 %v1150_v13, %v939_v37 }
 0x20e   : > { %v1315_v8 = vadd.f32 %v1314_v59, %v1151_v25  ;;  %v1318_v24 = vpop.f32.mrf.mxu0 }
 0x20f   : > { %v1468_v38 = vpop.f32.mrf.mxu1 }
 0x210   : > { %v1465_v36 = vadd.f32 %v1464_v47, %v1315_v8 }
 0x211   : > { %v943_v40 = vpop.f32.mrf.mxu2 }
 0x212   : > { %v1504_v44 = vmax.f32 %v1465_v36, 0.0  ;;  %v944_v49 = vadd.f32 %v943_v40, %v2697_v28 }
 0x213   : > { %v1156_v54 = vpop.f32.mrf.mxu3 }
 0x214   : > { %1537 = vst.msk [vmem:[%s2354_s6 + $0xe8] sm:$0xff] %vm1507_vm2, %v1504_v44  ;;  %v1157_v27 = vadd.f32 %v1156_v54, %v944_v49 }
 0x216   : > { %v1319_v57 = vadd.f32 %v1318_v24, %v1157_v27  ;;  %v1322_v33 = vpop.f32.mrf.mxu0 }
 0x217   : > { %v1472_v14 = vpop.f32.mrf.mxu1 }
 0x218   : > { %v1469_v45 = vadd.f32 %v1468_v38, %v1319_v57 }
 0x219   : > { %v948_v6 = vpop.f32.mrf.mxu2 }
 0x21a   : > { %v1505_v19 = vmax.f32 %v1469_v45, 0.0  ;;  %v949_v20 = vadd.f32 %v948_v6, %v2698_v56 }
 0x21b   : > { %v1162_v55 = vpop.f32.mrf.mxu3 }
 0x21c   : > { %1538 = vst.msk [vmem:[%s2354_s6 + $0xf0] sm:$0xff] %vm1507_vm2, %v1505_v19  ;;  %v1163_v62 = vadd.f32 %v1162_v55, %v949_v20 }
 0x21e   : > { %v1323_v61 = vadd.f32 %v1322_v33, %v1163_v62 }
 0x220   : > { %v1473_v60 = vadd.f32 %v1472_v14, %v1323_v61 }
 0x222   : > { %v1506_v3 = vmax.f32 %v1473_v60, 0.0 }
 0x224   : > { %1539 = vst.msk [vmem:[%s2354_s6 + $0xf8] sm:$0xff] %vm1507_vm2, %v1506_v3 }
 0x225 PF: > { %s13_s12 = sadd.s32 1, %s1632_s12  }
 0x226   : > { %p10_p4 = scmp.ge.s32.totalorder %s13_s12, 4  }
 0x228   :  { %12 = sbr.rel (!%p10_p4) target bundleno = 1 (0x1), region = 62 }

</bundles_post_ra>
